<compile_context>
chip_gen: v7x
topology: tpu7x:2x2x1
jax: 0.10.0
libtpu: 0.0.40
codegen_flags: <defaults>
</compile_context>

<pallas_src>
import functools

import jax
import jax.numpy as jnp
from jax.experimental import pallas as pl
from jax.experimental.pallas import tpu as pltpu


def _round_up(x: int, m: int) -> int:
    return ((x + m - 1) // m) * m


def _make_stats_kernel(tile_n: int, num_graphs_padded: int, nstats: int,
                       vdim: int, n_nodes: int, n_tiles: int, half: int,
                       overlap: bool):
    TN, Bp, K = tile_n, num_graphs_padded, nstats
    start1 = n_tiles - half          # first data tile handled by core 1

    def kernel(batch_ref, s_ref, v_ref, g_ref):
        c = pl.program_id(0)         # core-split index ('parallel')
        j = pl.program_id(1)         # per-core tile index ('arbitrary')

        @pl.when(j == 0)
        def _init():
            g_ref[...] = jnp.zeros_like(g_ref)

        # Data tile actually mapped by the index_map for this (c, j).
        tile = c * start1 + j
        row = jax.lax.broadcasted_iota(jnp.int32, (TN, 1), 0)
        valid = (tile * TN + row) < n_nodes          # ragged-tail row mask
        if overlap:
            # Odd tile count: core 1's first tile duplicates core 0's last tile;
            # zero its contribution entirely so nothing is double counted.
            is_dup = jnp.logical_and(c == 1, j == 0)
            valid = jnp.logical_and(valid, jnp.logical_not(is_dup))

        # Lane-dense transposed one-hot membership (graphs padded to 128 sublanes).
        batch = batch_ref[...]                                   # (1, TN) int32
        gid = jax.lax.broadcasted_iota(jnp.int32, (Bp, TN), 0)
        onehot_t = (gid == batch).astype(jnp.float32)            # (Bp, TN)

        s = s_ref[...].astype(jnp.float32)                       # (TN, sdim)
        vf = v_ref[...].astype(jnp.float32)                      # (TN, nvec*vdim)
        ones = jnp.ones((TN, 1), jnp.float32)
        smean = jnp.mean(s, axis=-1, keepdims=True)
        s2mean = jnp.mean(s * s, axis=-1, keepdims=True)
        # sum over nvec then mean over vdim == sum over flattened / vdim
        vmean = jnp.sum(vf * vf, axis=-1, keepdims=True) * (1.0 / vdim)
        stats = jnp.concatenate(
            [ones, smean, s2mean, vmean, jnp.zeros((TN, K - 4), jnp.float32)],
            axis=-1)                                             # (TN, K)
        # Zero masked rows: also kills NaN/Inf garbage from out-of-bounds reads of
        # the ragged tile so it cannot leak through 0 * NaN in the matmul below.
        stats = jnp.where(valid, stats, 0.0)

        # Scatter-add over graphs as one MXU matmul; accumulator stays resident.
        g_ref[...] += jnp.dot(onehot_t, stats,
                              preferred_element_type=jnp.float32,
                              precision=jax.lax.Precision.HIGHEST)

    return kernel


def _make_norm_kernel(tile_n: int, num_graphs_padded: int, nstats: int, eps: float):
    TN, Bp, K = tile_n, num_graphs_padded, nstats

    def kernel(gparts_ref, batch_ref, s_ref, v_ref, w_ref, b_ref,
               sout_ref, vout_ref):
        # Combine per-core partial sums and finalize the per-graph constants.
        # This is (128, 8) work recomputed per tile -- negligible vs. the data.
        acc = jnp.sum(gparts_ref[...], axis=0)                   # (Bp, K) f32
        counts = jnp.maximum(acc[:, 0:1], 1.0)
        inv_c = 1.0 / counts
        smean_g = acc[:, 1:2] * inv_c
        s2mean_g = acc[:, 2:3] * inv_c
        # Single-pass variance E_g[mean(s^2)] - smean_g^2 == the reference's
        # two-pass scatter_mean(mean((s - smean_g)^2)).  NOTE: mild cancellation
        # risk when |mean(s)| >> std(s); restore a two-pass variant if that
        # regime matters.
        var_g = jnp.maximum(s2mean_g - smean_g * smean_g, eps)   # clamp(min=eps)
        vmean_g = jnp.maximum(acc[:, 3:4] * inv_c, eps)
        gmat = jnp.concatenate(
            [smean_g, 1.0 / var_g, 1.0 / vmean_g,
             jnp.zeros((Bp, K - 3), jnp.float32)], axis=-1)      # (Bp, K)

        # Gather per-graph [smean, 1/var, 1/vmean] for every node: one MXU matmul.
        batch = batch_ref[...]                                   # (TN, 1) int32
        gid = jax.lax.broadcasted_iota(jnp.int32, (TN, Bp), 1)
        onehot = (gid == batch).astype(jnp.float32)              # (TN, Bp)
        node_vals = jnp.dot(onehot, gmat,
                            preferred_element_type=jnp.float32,
                            precision=jax.lax.Precision.HIGHEST)  # (TN, K)
        smean_n = node_vals[:, 0:1]
        inv_var_n = node_vals[:, 1:2]
        inv_vmean_n = node_vals[:, 2:3]

        s = s_ref[...].astype(jnp.float32)
        vf = v_ref[...].astype(jnp.float32)
        w = w_ref[...].astype(jnp.float32)
        b = b_ref[...].astype(jnp.float32)
        s_c = s - smean_n
        sout_ref[...] = (s_c * inv_var_n * w + b).astype(sout_ref.dtype)
        vout_ref[...] = (vf * inv_vmean_n).astype(vout_ref.dtype)

    return kernel


@functools.partial(jax.jit, static_argnames=("num_graphs", "eps", "tile_rows"))
def equiv_layer_norm(s, v, batch, weight_s, bias_s, *, num_graphs: int,
                     eps: float = 1e-6, tile_rows: int = 4096):
    N, sdim = s.shape
    _, nvec, vdim = v.shape
    VD = nvec * vdim
    NSTATS = 8                                     # [count, smean, s2mean, vmean, pad...]
    Bp = _round_up(max(int(num_graphs), 1), 128)   # graphs padded to full lane width

    # Node tiling: one full-extent tile when N fits, otherwise a large 128-aligned
    # tile (amortizes the ~0.35us per-grid-step overhead).  No padding of s/v: the
    # ragged last tile is masked in-kernel; nothing is sliced off afterwards.
    cap = max(128, _round_up(int(tile_rows), 128))
    TN = N if N <= cap else cap
    n_tiles = pl.cdiv(N, TN)

    # Stats pass core split: size-2 'parallel' axis so v7x's two TensorCores each
    # produce a partial (Bp, NSTATS) sum; combined inside the normalize pass.
    n_split = 2 if n_tiles >= 2 else 1
    half = pl.cdiv(n_tiles, n_split)
    overlap = (n_split == 2) and (n_tiles % 2 == 1)
    start1 = n_tiles - half                        # core 1's first data tile

    v2d = v.reshape(N, VD)                         # free row-major reshape
    batch_i = batch.astype(jnp.int32)
    batch_row = batch_i.reshape(1, N)              # stats pass (lane axis = nodes)
    batch_col = batch_i.reshape(N, 1)              # normalize pass
    w2d = weight_s.reshape(1, sdim)
    b2d = bias_s.reshape(1, sdim)

    # ---- pass 1: per-graph statistics (per-core resident accumulators) ----
    g_parts = pl.pallas_call(
        _make_stats_kernel(TN, Bp, NSTATS, vdim, N, n_tiles, half, overlap),
        out_shape=jax.ShapeDtypeStruct((n_split, Bp, NSTATS), jnp.float32),
        grid=(n_split, half),
        in_specs=[
            pl.BlockSpec((1, TN), lambda c, j: (0, c * start1 + j)),
            pl.BlockSpec((TN, sdim), lambda c, j: (c * start1 + j, 0)),
            pl.BlockSpec((TN, VD), lambda c, j: (c * start1 + j, 0)),
        ],
        out_specs=pl.BlockSpec((None, Bp, NSTATS), lambda c, j: (c, 0, 0)),
        compiler_params=pltpu.CompilerParams(
            dimension_semantics=("parallel", "arbitrary")),
        cost_estimate=pl.CostEstimate(
            flops=2 * N * Bp * NSTATS + 4 * N * (sdim + VD),
            transcendentals=0,
            bytes_accessed=4 * (N * (sdim + VD + 1) + n_split * Bp * NSTATS)),
    )(batch_row, s, v2d)

    # ---- pass 2: normalize (independent node tiles; 'parallel' shards TCs) ----
    sout, vout2d = pl.pallas_call(
        _make_norm_kernel(TN, Bp, NSTATS, eps),
        out_shape=(jax.ShapeDtypeStruct((N, sdim), s.dtype),
                   jax.ShapeDtypeStruct((N, VD), v.dtype)),
        grid=(n_tiles,),
        in_specs=[
            pl.BlockSpec((n_split, Bp, NSTATS), lambda i: (0, 0, 0)),
            pl.BlockSpec((TN, 1), lambda i: (i, 0)),
            pl.BlockSpec((TN, sdim), lambda i: (i, 0)),
            pl.BlockSpec((TN, VD), lambda i: (i, 0)),
            pl.BlockSpec((1, sdim), lambda i: (0, 0)),
            pl.BlockSpec((1, sdim), lambda i: (0, 0)),
        ],
        out_specs=(pl.BlockSpec((TN, sdim), lambda i: (i, 0)),
                   pl.BlockSpec((TN, VD), lambda i: (i, 0))),
        compiler_params=pltpu.CompilerParams(dimension_semantics=("parallel",)),
        cost_estimate=pl.CostEstimate(
            flops=2 * N * Bp * NSTATS + 5 * N * (sdim + VD),
            transcendentals=0,
            bytes_accessed=4 * (2 * N * (sdim + VD) + N
                                + n_split * Bp * NSTATS + 2 * sdim)),
    )(g_parts, batch_col, s, v2d, w2d, b2d)

    return sout, vout2d.reshape(N, nvec, vdim)


def _reference(s, v, batch, weight_s, bias_s, num_graphs, eps=1e-6):
    # Pure-JAX mirror of the PyTorch forward (two-pass variance, as in the module).
    counts = jax.ops.segment_sum(jnp.ones_like(batch, dtype=jnp.float32), batch, num_graphs)
    counts = jnp.maximum(counts, 1.0)

    smean = s.mean(axis=-1, keepdims=True)
    smean_g = jax.ops.segment_sum(smean[:, 0], batch, num_graphs) / counts
    s_c = s - smean_g[batch][:, None]
    var = (s_c * s_c).mean(axis=-1, keepdims=True)
    var_g = jax.ops.segment_sum(var[:, 0], batch, num_graphs) / counts
    var_g = jnp.clip(var_g, eps)
    sout = s_c / var_g[batch][:, None]
    sout = sout * weight_s + bias_s

    vmean = jnp.square(v).sum(axis=1).mean(axis=-1)
    vmean_g = jax.ops.segment_sum(vmean, batch, num_graphs) / counts
    vmean_g = jnp.clip(vmean_g, eps)
    vout = v / vmean_g[batch][:, None, None]
    return sout, vout


if __name__ == "__main__":
    eps = 1e-6

    def check(N, sizes, sdim, nvec, vdim, tile_rows, affine_random):
        B = len(sizes)
        key = jax.random.PRNGKey(0)
        k_s, k_v, k_w, k_b = jax.random.split(key, 4)
        s = jax.random.normal(k_s, (N, sdim), dtype=jnp.float32)
        v = jax.random.normal(k_v, (N, nvec, vdim), dtype=jnp.float32)
        batch = jnp.concatenate(
            [jnp.full((n_i,), g, jnp.int32) for g, n_i in enumerate(sizes)])
        assert batch.shape[0] == N
        if affine_random:
            weight_s = 1.0 + 0.1 * jax.random.normal(k_w, (sdim,), jnp.float32)
            bias_s = 0.1 * jax.random.normal(k_b, (sdim,), jnp.float32)
        else:
            # Deterministic parameter init (matches reset_parameters: ones / zeros).
            weight_s = jnp.ones((sdim,), jnp.float32)
            bias_s = jnp.zeros((sdim,), jnp.float32)

        sout, vout = equiv_layer_norm(s, v, batch, weight_s, bias_s,
                                      num_graphs=B, eps=eps, tile_rows=tile_rows)
        jax.block_until_ready((sout, vout))

        sref, vref = _reference(s, v, batch, weight_s, bias_s, B, eps)
        assert sout.shape == (N, sdim) and vout.shape == (N, nvec, vdim)
        assert jnp.allclose(sout, sref, rtol=1e-5, atol=1e-5), \
            float(jnp.max(jnp.abs(sout - sref)))
        assert jnp.allclose(vout, vref, rtol=1e-5, atol=1e-5), \
            float(jnp.max(jnp.abs(vout - vref)))

    # Small case: 24 nodes / 3 graphs, single tile (block == full arrays).
    check(24, (7, 9, 8), 32, 3, 16, tile_rows=4096, affine_random=False)
    # Multi-tile case: exercises the ragged last tile, the duplicate-tile masking
    # (odd tile count) and the 2-way core split of the stats pass.
    check(300, (83, 75, 97, 45), 32, 3, 16, tile_rows=128, affine_random=True)

    print("KERNEL_OK")
</pallas_src>

<mosaic_0001>
module attributes {stable_mosaic.version = 11 : i64} {
  func.func @kernel(%arg0: i32, %arg1: memref<1x128x8xf32, #tpu.memory_space<vmem>>, %arg2: memref<24x1xi32, #tpu.memory_space<vmem>>, %arg3: memref<24x32xf32, #tpu.memory_space<vmem>>, %arg4: memref<24x48xf32, #tpu.memory_space<vmem>>, %arg5: memref<1x32xf32, #tpu.memory_space<vmem>>, %arg6: memref<1x32xf32, #tpu.memory_space<vmem>>, %arg7: memref<24x32xf32, #tpu.memory_space<vmem>>, %arg8: memref<24x48xf32, #tpu.memory_space<vmem>>) attributes {dimension_semantics = [#tpu.dimension_semantics<parallel>], iteration_bounds = array<i64: 1>, scalar_prefetch = 0 : i64, scratch_operands = 0 : i64, tpu.core_type = #tpu.core_type<tc>, window_params = [{pipeline_mode = #tpu.pipeline_mode<synchronous>, transform_indices = @transform_0, window_bounds = array<i64: 1, 128, 8>}, {transform_indices = @transform_1, window_bounds = array<i64: 24, 1>}, {transform_indices = @transform_2, window_bounds = array<i64: 24, 32>}, {transform_indices = @transform_3, window_bounds = array<i64: 24, 48>}, {pipeline_mode = #tpu.pipeline_mode<synchronous>, transform_indices = @transform_4, window_bounds = array<i64: 1, 32>}, {pipeline_mode = #tpu.pipeline_mode<synchronous>, transform_indices = @transform_5, window_bounds = array<i64: 1, 32>}, {transform_indices = @transform_6, window_bounds = array<i64: 24, 32>}, {transform_indices = @transform_7, window_bounds = array<i64: 24, 48>}]} {
    %c0 = arith.constant 0 : index
    %c0_0 = arith.constant 0 : index
    %c0_1 = arith.constant 0 : index
    %0 = vector.load %arg1[%c0, %c0_0, %c0_1] : memref<1x128x8xf32, #tpu.memory_space<vmem>>, vector<1x128x8xf32>
    %cst = arith.constant dense<0.000000e+00> : vector<128x8xf32>
    %1 = vector.multi_reduction <add>, %0, %cst [0] : vector<1x128x8xf32> to vector<128x8xf32>
    %2 = vector.extract_strided_slice %1 {offsets = [0, 0], sizes = [128, 1], strides = [1, 1]} : vector<128x8xf32> to vector<128x1xf32>
    %cst_2 = arith.constant 1.000000e+00 : f32
    %3 = vector.broadcast %cst_2 : f32 to vector<128x1xf32>
    %4 = arith.maximumf %2, %3 : vector<128x1xf32>
    %cst_3 = arith.constant 1.000000e+00 : f32
    %5 = vector.broadcast %cst_3 : f32 to vector<128x1xf32>
    %6 = arith.divf %5, %4 : vector<128x1xf32>
    %7 = vector.extract_strided_slice %1 {offsets = [0, 1], sizes = [128, 1], strides = [1, 1]} : vector<128x8xf32> to vector<128x1xf32>
    %8 = arith.mulf %7, %6 : vector<128x1xf32>
    %9 = vector.extract_strided_slice %1 {offsets = [0, 2], sizes = [128, 1], strides = [1, 1]} : vector<128x8xf32> to vector<128x1xf32>
    %10 = arith.mulf %9, %6 : vector<128x1xf32>
    %11 = arith.mulf %8, %8 : vector<128x1xf32>
    %12 = arith.subf %10, %11 : vector<128x1xf32>
    %cst_4 = arith.constant 9.99999997E-7 : f32
    %13 = vector.broadcast %cst_4 : f32 to vector<128x1xf32>
    %14 = arith.maximumf %12, %13 : vector<128x1xf32>
    %15 = vector.extract_strided_slice %1 {offsets = [0, 3], sizes = [128, 1], strides = [1, 1]} : vector<128x8xf32> to vector<128x1xf32>
    %16 = arith.mulf %15, %6 : vector<128x1xf32>
    %cst_5 = arith.constant 9.99999997E-7 : f32
    %17 = vector.broadcast %cst_5 : f32 to vector<128x1xf32>
    %18 = arith.maximumf %16, %17 : vector<128x1xf32>
    %cst_6 = arith.constant 1.000000e+00 : f32
    %19 = vector.broadcast %cst_6 : f32 to vector<128x1xf32>
    %20 = arith.divf %19, %14 : vector<128x1xf32>
    %cst_7 = arith.constant 1.000000e+00 : f32
    %21 = vector.broadcast %cst_7 : f32 to vector<128x1xf32>
    %22 = arith.divf %21, %18 : vector<128x1xf32>
    %cst_8 = arith.constant 0.000000e+00 : f32
    %23 = vector.broadcast %cst_8 : f32 to vector<128x5xf32>
    %24 = tpu.concatenate %8, %20, %22, %23 in 1 : vector<128x1xf32>, vector<128x1xf32>, vector<128x1xf32>, vector<128x5xf32> -> vector<128x8xf32>
    %c0_9 = arith.constant 0 : index
    %c0_10 = arith.constant 0 : index
    %25 = vector.load %arg2[%c0_9, %c0_10] : memref<24x1xi32, #tpu.memory_space<vmem>>, vector<24x1xi32>
    %26 = tpu.iota {dimensions = array<i32: 1>} : vector<24x128xi32>
    %27 = vector.broadcast %25 : vector<24x1xi32> to vector<24x128xi32>
    %28 = arith.cmpi eq, %26, %27 : vector<24x128xi32>
    %29 = arith.extui %28 : vector<24x128xi1> to vector<24x128xi32>
    %30 = arith.sitofp %29 : vector<24x128xi32> to vector<24x128xf32>
    %cst_11 = arith.constant dense<0.000000e+00> : vector<24x8xf32>
    %31 = tpu.matmul %30, %24, %cst_11 {dimension_numbers = #tpu.dot_dimension_numbers<[1], [0], [0], [1], [0, 0, 1, 1], [], []>, precision = #tpu.contract_precision<fp32>} : vector<24x128xf32>, vector<128x8xf32>, vector<24x8xf32> -> vector<24x8xf32>
    %32 = vector.extract_strided_slice %31 {offsets = [0, 0], sizes = [24, 1], strides = [1, 1]} : vector<24x8xf32> to vector<24x1xf32>
    %33 = vector.extract_strided_slice %31 {offsets = [0, 1], sizes = [24, 1], strides = [1, 1]} : vector<24x8xf32> to vector<24x1xf32>
    %34 = vector.extract_strided_slice %31 {offsets = [0, 2], sizes = [24, 1], strides = [1, 1]} : vector<24x8xf32> to vector<24x1xf32>
    %c0_12 = arith.constant 0 : index
    %c0_13 = arith.constant 0 : index
    %35 = vector.load %arg3[%c0_12, %c0_13] : memref<24x32xf32, #tpu.memory_space<vmem>>, vector<24x32xf32>
    %c0_14 = arith.constant 0 : index
    %c0_15 = arith.constant 0 : index
    %36 = vector.load %arg4[%c0_14, %c0_15] : memref<24x48xf32, #tpu.memory_space<vmem>>, vector<24x48xf32>
    %c0_16 = arith.constant 0 : index
    %c0_17 = arith.constant 0 : index
    %37 = vector.load %arg5[%c0_16, %c0_17] : memref<1x32xf32, #tpu.memory_space<vmem>>, vector<1x32xf32>
    %c0_18 = arith.constant 0 : index
    %c0_19 = arith.constant 0 : index
    %38 = vector.load %arg6[%c0_18, %c0_19] : memref<1x32xf32, #tpu.memory_space<vmem>>, vector<1x32xf32>
    %39 = vector.broadcast %32 : vector<24x1xf32> to vector<24x32xf32>
    %40 = arith.subf %35, %39 : vector<24x32xf32>
    %41 = vector.broadcast %33 : vector<24x1xf32> to vector<24x32xf32>
    %42 = arith.mulf %40, %41 : vector<24x32xf32>
    %43 = vector.broadcast %37 : vector<1x32xf32> to vector<24x32xf32>
    %44 = arith.mulf %42, %43 : vector<24x32xf32>
    %45 = vector.broadcast %38 : vector<1x32xf32> to vector<24x32xf32>
    %46 = arith.addf %44, %45 : vector<24x32xf32>
    %c0_20 = arith.constant 0 : index
    %c0_21 = arith.constant 0 : index
    %47 = vector.load %arg7[%c0_20, %c0_21] : memref<24x32xf32, #tpu.memory_space<vmem>>, vector<24x32xf32>
    tpu.vector_store %arg7[%c0_20, %c0_21], %46 {strides = array<i32>} : memref<24x32xf32, #tpu.memory_space<vmem>>, vector<24x32xf32>,
    %48 = vector.broadcast %34 : vector<24x1xf32> to vector<24x48xf32>
    %49 = arith.mulf %36, %48 : vector<24x48xf32>
    %c0_22 = arith.constant 0 : index
    %c0_23 = arith.constant 0 : index
    %50 = vector.load %arg8[%c0_22, %c0_23] : memref<24x48xf32, #tpu.memory_space<vmem>>, vector<24x48xf32>
    tpu.vector_store %arg8[%c0_22, %c0_23], %49 {strides = array<i32>} : memref<24x48xf32, #tpu.memory_space<vmem>>, vector<24x48xf32>,
    return
  }
  func.func @transform_0(%arg0: i32) -> (i32, i32, i32) {
    %c0_i32 = arith.constant 0 : i32
    %c0_i32_0 = arith.constant 0 : i32
    %c0_i32_1 = arith.constant 0 : i32
    %c0_i32_2 = arith.constant 0 : i32
    return %c0_i32, %c0_i32_0, %c0_i32_1 : i32, i32, i32
  }
  func.func @transform_1(%arg0: i32) -> (i32, i32) {
    %c0_i32 = arith.constant 0 : i32
    %c0_i32_0 = arith.constant 0 : i32
    return %arg0, %c0_i32 : i32, i32
  }
  func.func @transform_2(%arg0: i32) -> (i32, i32) {
    %c0_i32 = arith.constant 0 : i32
    %c0_i32_0 = arith.constant 0 : i32
    return %arg0, %c0_i32 : i32, i32
  }
  func.func @transform_3(%arg0: i32) -> (i32, i32) {
    %c0_i32 = arith.constant 0 : i32
    %c0_i32_0 = arith.constant 0 : i32
    return %arg0, %c0_i32 : i32, i32
  }
  func.func @transform_4(%arg0: i32) -> (i32, i32) {
    %c0_i32 = arith.constant 0 : i32
    %c0_i32_0 = arith.constant 0 : i32
    %c0_i32_1 = arith.constant 0 : i32
    return %c0_i32, %c0_i32_0 : i32, i32
  }
  func.func @transform_5(%arg0: i32) -> (i32, i32) {
    %c0_i32 = arith.constant 0 : i32
    %c0_i32_0 = arith.constant 0 : i32
    %c0_i32_1 = arith.constant 0 : i32
    return %c0_i32, %c0_i32_0 : i32, i32
  }
  func.func @transform_6(%arg0: i32) -> (i32, i32) {
    %c0_i32 = arith.constant 0 : i32
    %c0_i32_0 = arith.constant 0 : i32
    return %arg0, %c0_i32 : i32, i32
  }
  func.func @transform_7(%arg0: i32) -> (i32, i32) {
    %c0_i32 = arith.constant 0 : i32
    %c0_i32_0 = arith.constant 0 : i32
    return %arg0, %c0_i32 : i32, i32
  }
}

module attributes {stable_mosaic.version = 11 : i64} {
  func.func @kernel(%arg0: i32, %arg1: i32, %arg2: memref<1x24xi32, #tpu.memory_space<vmem>>, %arg3: memref<24x32xf32, #tpu.memory_space<vmem>>, %arg4: memref<24x48xf32, #tpu.memory_space<vmem>>, %arg5: memref<1x128x8xf32, #tpu.memory_space<vmem>>) attributes {dimension_semantics = [#tpu.dimension_semantics<parallel>, #tpu.dimension_semantics<arbitrary>], iteration_bounds = array<i64: 1, 1>, scalar_prefetch = 0 : i64, scratch_operands = 0 : i64, tpu.core_type = #tpu.core_type<tc>, window_params = [{transform_indices = @transform_0, window_bounds = array<i64: 1, 24>}, {transform_indices = @transform_1, window_bounds = array<i64: 24, 32>}, {transform_indices = @transform_2, window_bounds = array<i64: 24, 48>}, {transform_indices = @transform_3, window_bounds = array<i64: 1, 128, 8>}]} {
    %c0_i32 = arith.constant 0 : i32
    %0 = arith.cmpi eq, %arg1, %c0_i32 : i32
    %1 = arith.extui %0 : i1 to i32
    %c0_i32_0 = arith.constant 0 : i32
    %2 = arith.cmpi ne, %1, %c0_i32_0 : i32
    scf.if %2 {
      %cst_23 = arith.constant 0.000000e+00 : f32
      %47 = vector.broadcast %cst_23 : f32 to vector<128x8xf32>
      %c0_24 = arith.constant 0 : index
      %c0_25 = arith.constant 0 : index
      %c0_26 = arith.constant 0 : index
      %48 = vector.load %arg5[%c0_24, %c0_25, %c0_26] : memref<1x128x8xf32, #tpu.memory_space<vmem>>, vector<1x128x8xf32>
      %49 = vector.shape_cast %48 : vector<1x128x8xf32> to vector<128x8xf32>
      %50 = vector.shape_cast %47 : vector<128x8xf32> to vector<1x128x8xf32>
      tpu.vector_store %arg5[%c0_24, %c0_25, %c0_26], %50 {strides = array<i32>} : memref<1x128x8xf32, #tpu.memory_space<vmem>>, vector<1x128x8xf32>,
    } else {
    }
    %c0_i32_1 = arith.constant 0 : i32
    %3 = arith.muli %arg0, %c0_i32_1 : i32
    %4 = arith.addi %3, %arg1 : i32
    %5 = tpu.iota {dimensions = array<i32: 0>} : vector<24x1xi32>
    %c24_i32 = arith.constant 24 : i32
    %6 = arith.muli %4, %c24_i32 : i32
    %7 = vector.broadcast %6 : i32 to vector<24x1xi32>
    %8 = arith.addi %7, %5 : vector<24x1xi32>
    %c24_i32_2 = arith.constant 24 : i32
    %9 = vector.broadcast %c24_i32_2 : i32 to vector<24x1xi32>
    %10 = arith.cmpi slt, %8, %9 : vector<24x1xi32>
    %c0 = arith.constant 0 : index
    %c0_3 = arith.constant 0 : index
    %11 = vector.load %arg2[%c0, %c0_3] : memref<1x24xi32, #tpu.memory_space<vmem>>, vector<1x24xi32>
    %12 = tpu.iota {dimensions = array<i32: 0>} : vector<128x24xi32>
    %13 = vector.broadcast %11 : vector<1x24xi32> to vector<128x24xi32>
    %14 = arith.cmpi eq, %12, %13 : vector<128x24xi32>
    %15 = arith.extui %14 : vector<128x24xi1> to vector<128x24xi32>
    %16 = arith.sitofp %15 : vector<128x24xi32> to vector<128x24xf32>
    %c0_4 = arith.constant 0 : index
    %c0_5 = arith.constant 0 : index
    %17 = vector.load %arg3[%c0_4, %c0_5] : memref<24x32xf32, #tpu.memory_space<vmem>>, vector<24x32xf32>
    %c0_6 = arith.constant 0 : index
    %c0_7 = arith.constant 0 : index
    %18 = vector.load %arg4[%c0_6, %c0_7] : memref<24x48xf32, #tpu.memory_space<vmem>>, vector<24x48xf32>
    %cst = arith.constant 1.000000e+00 : f32
    %19 = vector.broadcast %cst : f32 to vector<24x1xf32>
    %cst_8 = arith.constant dense<0.000000e+00> : vector<24xf32>
    %20 = vector.multi_reduction <add>, %17, %cst_8 [1] : vector<24x32xf32> to vector<24xf32>
    %21 = vector.shape_cast %20 : vector<24xf32> to vector<24x1xf32>
    %cst_9 = arith.constant 3.200000e+01 : f32
    %22 = vector.broadcast %cst_9 : f32 to vector<24x1xf32>
    %23 = arith.divf %21, %22 : vector<24x1xf32>
    %24 = arith.mulf %17, %17 : vector<24x32xf32>
    %cst_10 = arith.constant dense<0.000000e+00> : vector<24xf32>
    %25 = vector.multi_reduction <add>, %24, %cst_10 [1] : vector<24x32xf32> to vector<24xf32>
    %26 = vector.shape_cast %25 : vector<24xf32> to vector<24x1xf32>
    %cst_11 = arith.constant 3.200000e+01 : f32
    %27 = vector.broadcast %cst_11 : f32 to vector<24x1xf32>
    %28 = arith.divf %26, %27 : vector<24x1xf32>
    %29 = arith.mulf %18, %18 : vector<24x48xf32>
    %cst_12 = arith.constant dense<0.000000e+00> : vector<24xf32>
    %30 = vector.multi_reduction <add>, %29, %cst_12 [1] : vector<24x48xf32> to vector<24xf32>
    %31 = vector.shape_cast %30 : vector<24xf32> to vector<24x1xf32>
    %cst_13 = arith.constant 6.250000e-02 : f32
    %32 = vector.broadcast %cst_13 : f32 to vector<24x1xf32>
    %33 = arith.mulf %31, %32 : vector<24x1xf32>
    %cst_14 = arith.constant 0.000000e+00 : f32
    %34 = vector.broadcast %cst_14 : f32 to vector<24x4xf32>
    %35 = tpu.concatenate %19, %23, %28, %33, %34 in 1 : vector<24x1xf32>, vector<24x1xf32>, vector<24x1xf32>, vector<24x1xf32>, vector<24x4xf32> -> vector<24x8xf32>
    %cst_15 = arith.constant 0.000000e+00 : f32
    %36 = vector.shape_cast %10 : vector<24x1xi1> to vector<24x1xi1>
    %37 = vector.broadcast %36 : vector<24x1xi1> to vector<24x8xi1>
    %38 = vector.broadcast %cst_15 : f32 to vector<24x8xf32>
    %39 = arith.select %37, %35, %38 : vector<24x8xi1>, vector<24x8xf32>
    %c0_16 = arith.constant 0 : index
    %c0_17 = arith.constant 0 : index
    %c0_18 = arith.constant 0 : index
    %40 = vector.load %arg5[%c0_16, %c0_17, %c0_18] : memref<1x128x8xf32, #tpu.memory_space<vmem>>, vector<1x128x8xf32>
    %41 = vector.shape_cast %40 : vector<1x128x8xf32> to vector<128x8xf32>
    %cst_19 = arith.constant dense<0.000000e+00> : vector<128x8xf32>
    %42 = tpu.matmul %16, %39, %cst_19 {dimension_numbers = #tpu.dot_dimension_numbers<[1], [0], [0], [1], [0, 0, 1, 1], [], []>, precision = #tpu.contract_precision<fp32>} : vector<128x24xf32>, vector<24x8xf32>, vector<128x8xf32> -> vector<128x8xf32>
    %43 = arith.addf %41, %42 : vector<128x8xf32>
    %c0_20 = arith.constant 0 : index
    %c0_21 = arith.constant 0 : index
    %c0_22 = arith.constant 0 : index
    %44 = vector.load %arg5[%c0_20, %c0_21, %c0_22] : memref<1x128x8xf32, #tpu.memory_space<vmem>>, vector<1x128x8xf32>
    %45 = vector.shape_cast %44 : vector<1x128x8xf32> to vector<128x8xf32>
    %46 = vector.shape_cast %43 : vector<128x8xf32> to vector<1x128x8xf32>
    tpu.vector_store %arg5[%c0_20, %c0_21, %c0_22], %46 {strides = array<i32>} : memref<1x128x8xf32, #tpu.memory_space<vmem>>, vector<1x128x8xf32>,
    return
  }
  func.func @transform_0(%arg0: i32, %arg1: i32) -> (i32, i32) {
    %c0_i32 = arith.constant 0 : i32
    %0 = arith.muli %arg0, %c0_i32 : i32
    %1 = arith.addi %0, %arg1 : i32
    %c0_i32_0 = arith.constant 0 : i32
    %c0_i32_1 = arith.constant 0 : i32
    return %c0_i32_0, %1 : i32, i32
  }
  func.func @transform_1(%arg0: i32, %arg1: i32) -> (i32, i32) {
    %c0_i32 = arith.constant 0 : i32
    %0 = arith.muli %arg0, %c0_i32 : i32
    %1 = arith.addi %0, %arg1 : i32
    %c0_i32_0 = arith.constant 0 : i32
    %c0_i32_1 = arith.constant 0 : i32
    return %1, %c0_i32_0 : i32, i32
  }
  func.func @transform_2(%arg0: i32, %arg1: i32) -> (i32, i32) {
    %c0_i32 = arith.constant 0 : i32
    %0 = arith.muli %arg0, %c0_i32 : i32
    %1 = arith.addi %0, %arg1 : i32
    %c0_i32_0 = arith.constant 0 : i32
    %c0_i32_1 = arith.constant 0 : i32
    return %1, %c0_i32_0 : i32, i32
  }
  func.func @transform_3(%arg0: i32, %arg1: i32) -> (i32, i32, i32) {
    %c0_i32 = arith.constant 0 : i32
    %c0_i32_0 = arith.constant 0 : i32
    %c0_i32_1 = arith.constant 0 : i32
    return %arg0, %c0_i32, %c0_i32_0 : i32, i32, i32
  }
}

</mosaic_0001>

<bundles_post_ra>
// kernel: equiv_layer_norm.2
= control target key start
LH: loop header
LB: loop body
LE: loop exit
PB: predicated region body
PF: predicated region fallthrough
CT: control target
= control target key end

     0   :  { %vm119_vm0 = vcmask 261120   ;;  %vm151_vm1 = vcmask 392192   ;;  %v35_v21 = vlaneseq  ;;  %v1872_v25 = vmov 0.0   ;;  %s2539_s1 = inlined_call_operand.vmem [shape: f32[24,32], index: 1, kind: input, shape index: {}]   ;;  %s2540_s2 = inlined_call_operand.vmem [shape: f32[24,48], index: 2, kind: input, shape index: {}]   ;;  %s2541_s0 = inlined_call_operand.vmem [shape: s32[1,24], index: 0, kind: input, shape index: {}]   ;;  %s2542_s3 = inlined_call_operand.vmem [shape: f32[1,128,8], index: 3, kind: output, shape index: {}]  }
   0x1   :  { %v113_v0 = vld [vmem:[%s2539_s1] sm:$0xff]  ;;  %v114_v1 = vld [vmem:[%s2539_s1 + $0x8] sm:$0xff]  ;;  %v115_v12 = vld [vmem:[%s2539_s1 + $0x10] sm:$0xff]  ;;  %vm205_vm3 = vcmask 195584  }
   0x2   :  { %v116_v2 = vld [vmem:[%s2540_s2] sm:$0xff]  ;;  %v120_v3 = vsel %vm119_vm0, %v113_v0, 0.0  ;;  %v133_v4 = vmul.f32 %v113_v0, %v113_v0  ;;  %v134_v5 = vmul.f32 %v114_v1, %v114_v1  ;;  %v117_v6 = vld [vmem:[%s2540_s2 + $0x8] sm:$0xff]  ;;  %v123_v8 = vsel %vm119_vm0, %v114_v1, 0.0  ;;  %v118_v14 = vld [vmem:[%s2540_s2 + $0x10] sm:$0xff] }
   0x3   :  { %121 = vadd.xlane.f32.xlu0 %v120_v3  ;;  %v148_v9 = vmul.f32 %v116_v2, %v116_v2  ;;  %v149_v11 = vmul.f32 %v117_v6, %v117_v6  ;;  %v135_v16 = vmul.f32 %v115_v12, %v115_v12  ;;  %v126_v17 = vsel %vm119_vm0, %v115_v12, 0.0  ;;  %v1923_v23 = vld [vmem:[%s2541_s0] ss:$0 sm:$0xff] }
   0x4   :  { %v136_v7 = vsel %vm119_vm0, %v133_v4, 0.0  ;;  %v139_v10 = vsel %vm119_vm0, %v134_v5, 0.0  ;;  %v150_v18 = vmul.f32 %v118_v14, %v118_v14  ;;  %v36_v22 = vshrl.u32 %v35_v21, 7 }
   0x5   :  { %137 = vadd.xlane.f32.xlu1 %v136_v7  ;;  %v152_v13 = vsel %vm151_vm1, %v148_v9, 0.0  ;;  %v155_v15 = vsel %vm151_vm1, %v149_v11, 0.0  ;;  %v142_v19 = vsel %vm119_vm0, %v135_v16, 0.0 }
   0x6   :  { %v158_v20 = vsel %vm151_vm1, %v150_v18, 0.0  ;;  %v37_v24 = vadd.s32 8, %v36_v22  ;;  %vm65_vm2 = vcmp.eq.s32.totalorder %v36_v22, %v1923_v23  ;;  %v38_v29 = vadd.s32 16, %v36_v22 }
   0x7   :  { %124 = vadd.xlane.f32.xlu0 %v123_v8  ;;  %v1927_v26 = vsel %vm65_vm2, 1.0, %v1872_v25  ;;  %v48_v30 = vadd.s32 24, %v36_v22  ;;  %v49_v33 = vadd.s32 32, %v36_v22  ;;  %v50_v34 = vadd.s32 40, %v36_v22 }
   0x8   :  { %vm66_vm4 = vcmp.eq.s32.totalorder %v37_v24, %v1923_v23  ;;  %v207_v27 = vsel %vm205_vm3, %v1927_v26, 0  ;;  %vm67_vm5 = vcmp.eq.s32.totalorder %v38_v29, %v1923_v23  ;;  %v51_v36 = vadd.s32 48, %v36_v22 }
   0x9   :  { %140 = vadd.xlane.f32.xlu1 %v139_v10  ;;  %v1932_v28 = vsub.f32 %v207_v27, %v207_v27  ;;  %vm68_vm6 = vcmp.eq.s32.totalorder %v48_v30, %v1923_v23  ;;  %vm69_vm7 = vcmp.eq.s32.totalorder %v49_v33, %v1923_v23  ;;  %vm70_vm8 = vcmp.eq.s32.totalorder %v50_v34, %v1923_v23 }
   0xa   :  { %v1940_v37 = vadd.s32 56, %v36_v22  ;;  %vm71_vm9 = vcmp.eq.s32.totalorder %v51_v36, %v1923_v23  ;;  %v1945_v38 = vadd.s32 64, %v36_v22  ;;  %v1947_v39 = vadd.s32 72, %v36_v22 }
   0xb   :  { %153 = vadd.xlane.f32.xlu0 %v152_v13  ;;  %v324_v31 = vand.u32 4294901760, %v1932_v28  ;;  %v1953_v40 = vadd.s32 80, %v36_v22  ;;  %v1955_v41 = vadd.s32 88, %v36_v22  ;;  %v1961_v42 = vadd.s32 96, %v36_v22 }
   0xc   :  { %vm72_vm10 = vcmp.eq.s32.totalorder %v1940_v37, %v1923_v23  ;;  %vm73_vm11 = vcmp.eq.s32.totalorder %v1945_v38, %v1923_v23  ;;  %vm74_vm12 = vcmp.eq.s32.totalorder %v1947_v39, %v1923_v23  ;;  %v1963_v43 = vadd.s32 104, %v36_v22 }
   0xd   :  { %156 = vadd.xlane.f32.xlu1 %v155_v15  ;;  %v325_v32 = vsub.f32 %v1932_v28, %v324_v31  ;;  %1683 = vmatprep.mubr.f32.mxu0 %v324_v31  ;;  %vm75_vm13 = vcmp.eq.s32.totalorder %v1953_v40, %v1923_v23  ;;  %vm76_vm14 = vcmp.eq.s32.totalorder %v1955_v41, %v1923_v23  ;;  %v1969_v44 = vadd.s32 112, %v36_v22 }
   0xe   :  { %vm77_vm15 = vcmp.eq.s32.totalorder %v1961_v42, %v1923_v23  ;;  %vm78_vm0 = vcmp.eq.s32.totalorder %v1963_v43, %v1923_v23  ;;  %v1971_v45 = vadd.s32 120, %v36_v22  ;;  %v1980_v46 = vsel %vm66_vm4, 1.0, %v1872_v25 }
   0xf   :  { %127 = vadd.xlane.f32.xlu0 %v126_v17  ;;  %v326_v35 = vand.u32 4294901760, %v325_v32  ;;  %vm79_vm1 = vcmp.eq.s32.totalorder %v1969_v44, %v1923_v23  ;;  %v210_v47 = vsel %vm205_vm3, %v1980_v46, 0  ;;  %v1989_v49 = vsel %vm67_vm5, 1.0, %v1872_v25 }
  0x10   :  { %v1984_v48 = vsub.f32 %v210_v47, %v210_v47  ;;  %v1994_v51 = vsel %vm68_vm6, 1.0, %v1872_v25  ;;  %v213_v52 = vsel %vm205_vm3, %v1989_v49, 0  ;;  %vm164_vm4 = vcmask 7168  }
  0x11   :  { %143 = vadd.xlane.f32.xlu1 %v142_v19  ;;  %1593 = vmatprep.mubr.f32.mxu1 %v326_v35  ;;  %v216_v56 = vsel %vm205_vm3, %v1994_v51, 0  ;;  %v2001_v58 = vsub.f32 %v213_v52, %v213_v52  ;;  %vm168_vm5 = vcmask 15360   ;;  %vm172_vm6 = vcmask 23552  }
  0x12   :  { %v334_v54 = vand.u32 4294901760, %v1984_v48  ;;  %v2008_v63 = vsub.f32 %v216_v56, %v216_v56  ;;  %v2015_v4 = vsel %vm69_vm7, 1.0, %v1872_v25  ;;  %vm176_vm2 = vcmask 31744  }
  0x13   :  { %159 = vadd.xlane.f32.xlu0 %v158_v20  ;;  %v344_v3 = vand.u32 4294901760, %v2001_v58  ;;  %v2021_v7 = vsel %vm70_vm8, 1.0, %v1872_v25  ;;  %v219_v14 = vsel %vm205_vm3, %v2015_v4, 0  ;;  %v2032_v15 = vsel %vm71_vm9, 1.0, %v1872_v25 }
  0x14   :  { %v2006_v62 = vsub.f32 %v1984_v48, %v334_v54  ;;  %v354_v11 = vand.u32 4294901760, %v2008_v63  ;;  %v222_v20 = vsel %vm205_vm3, %v2021_v7, 0  ;;  %v2048_v27 = vsel %vm72_vm10, 1.0, %v1872_v25 }
  0x15   :  { %v2039_v19 = vsub.f32 %v2001_v58, %v344_v3  ;;  %v2051_v31 = vsub.f32 %v219_v14, %v219_v14  ;;  %v225_v32 = vsel %vm205_vm3, %v2032_v15, 0  ;;  %v2059_v33 = vsel %vm73_vm11, 1.0, %v1872_v25 }
  0x16   :  { %v336_v10 = vand.u32 4294901760, %v2006_v62  ;;  %v2068_v52 = vsub.f32 %v2008_v63, %v354_v11  ;;  %v228_v38 = vsel %vm205_vm3, %v2048_v27, 0  ;;  %vm2543_vm7 = vcmp.eq.s32.totalorder %v1971_v45, %v1923_v23 }
  0x17   :  { %v2106_v14 = vsub.f32 %v228_v38, %v228_v38  ;;  %vm18_vm8 = vcmask 64512  }
  0x18   :  { %v356_v40 = vand.u32 4294901760, %v2068_v52  ;;  %20 = vst.msk [vmem:[%s2542_s3 + $0x8] sm:$0xff] %vm18_vm8, %v1872_v25  ;;  %19 = vst.msk [vmem:[%s2542_s3] sm:$0xff] %vm18_vm8, %v1872_v25 }
  0x19   :  { %21 = vst.msk [vmem:[%s2542_s3 + $0x10] sm:$0xff] %vm18_vm8, %v1872_v25  ;;  %22 = vst.msk [vmem:[%s2542_s3 + $0x18] sm:$0xff] %vm18_vm8, %v1872_v25 }
  0x1a   :  { %23 = vst.msk [vmem:[%s2542_s3 + $0x20] sm:$0xff] %vm18_vm8, %v1872_v25  ;;  %24 = vst.msk [vmem:[%s2542_s3 + $0x28] sm:$0xff] %vm18_vm8, %v1872_v25 }
  0x1b   :  { %25 = vst.msk [vmem:[%s2542_s3 + $0x30] sm:$0xff] %vm18_vm8, %v1872_v25  ;;  %26 = vst.msk [vmem:[%s2542_s3 + $0x38] sm:$0xff] %vm18_vm8, %v1872_v25 }
  0x1c   :  { %27 = vst.msk [vmem:[%s2542_s3 + $0x40] sm:$0xff] %vm18_vm8, %v1872_v25  ;;  %28 = vst.msk [vmem:[%s2542_s3 + $0x48] sm:$0xff] %vm18_vm8, %v1872_v25 }
  0x1d   :  { %29 = vst.msk [vmem:[%s2542_s3 + $0x50] sm:$0xff] %vm18_vm8, %v1872_v25  ;;  %30 = vst.msk [vmem:[%s2542_s3 + $0x58] sm:$0xff] %vm18_vm8, %v1872_v25 }
  0x1e   :  { %31 = vst.msk [vmem:[%s2542_s3 + $0x60] sm:$0xff] %vm18_vm8, %v1872_v25  ;;  %32 = vst.msk [vmem:[%s2542_s3 + $0x68] sm:$0xff] %vm18_vm8, %v1872_v25 }
  0x1f   :  { %33 = vst.msk [vmem:[%s2542_s3 + $0x70] sm:$0xff] %vm18_vm8, %v1872_v25  ;;  %34 = vst.msk [vmem:[%s2542_s3 + $0x78] sm:$0xff] %vm18_vm8, %v1872_v25 }
  0x90   :  { %v122_v50 = vpop.xlane.xlu0 %121 }
  0x91   :  { %v130_v55 = vmul.f32 0.03125, %v122_v50  ;;  %v346_v50 = vand.u32 4294901760, %v2039_v19 }
  0x92   :  { %v138_v53 = vpop.xlane.xlu1 %137 }
  0x93   :  { %v145_v60 = vmul.f32 0.03125, %v138_v53  ;;  %v165_v0 = vsel %vm164_vm4, 1.0, %v130_v55  ;;  %v2070_v53 = vsub.f32 %v222_v20, %v222_v20 }
  0x94   :  { %v125_v57 = vpop.xlane.xlu0 %124 }
  0x95   :  { %v131_v59 = vmul.f32 0.03125, %v125_v57  ;;  %v169_v8 = vsel %vm168_vm5, %v165_v0, %v145_v60  ;;  %v2081_v0 = vsub.f32 %v225_v32, %v225_v32 }
  0x96   :  { %v141_v61 = vpop.xlane.xlu1 %140 }
  0x97   :  { %v146_v1 = vmul.f32 0.03125, %v141_v61  ;;  %v166_v5 = vsel %vm164_vm4, 1.0, %v131_v59  ;;  %v364_v61 = vand.u32 4294901760, %v2051_v31  ;;  %v384_v19 = vand.u32 4294901760, %v2081_v0 }
  0x98   :  { %v154_v2 = vpop.xlane.xlu0 %153 }
  0x99   :  { %v161_v6 = vmul.f32 0.0625, %v154_v2  ;;  %v170_v16 = vsel %vm168_vm5, %v166_v5, %v146_v1  ;;  %v231_v1 = vsel %vm205_vm3, %v2059_v33, 0 }
  0x9a   :  { %v157_v9 = vpop.xlane.xlu1 %156 }
  0x9b   :  { %v173_v12 = vsel %vm172_vm6, %v169_v8, %v161_v6  ;;  %v162_v13 = vmul.f32 0.0625, %v157_v9  ;;  %v2093_v6 = vsel %vm74_vm12, 1.0, %v1872_v25  ;;  %v2099_v8 = vsel %vm75_vm13, 1.0, %v1872_v25 }
  0x9c   :  { %v177_v17 = vsel %vm176_vm2, %v173_v12, 0.0  ;;  %v128_v18 = vpop.xlane.xlu0 %127  ;;  %v234_v20 = vsel %vm205_vm3, %v2093_v6, 0 }
  0x9d   :  { %v255_v21 = vand.u32 4294901760, %v177_v17  ;;  %v174_v22 = vsel %vm172_vm6, %v170_v16, %v162_v13  ;;  %v132_v24 = vmul.f32 0.03125, %v128_v18  ;;  %v374_v13 = vand.u32 4294901760, %v2070_v53 }
  0x9e   :  { %v178_v29 = vsel %vm176_vm2, %v174_v22, 0.0  ;;  %v144_v30 = vpop.xlane.xlu1 %143  ;;  %v365_v18 = vsub.f32 %v2051_v31, %v364_v61  ;;  %v2151_v38 = vsub.f32 %v234_v20, %v234_v20  ;;  %v2197_v20 = vsel %vm2543_vm7, 1.0, %v1872_v25 }
  0x9f   :  { %v2061_v34 = vsub.f32 %v177_v17, %v255_v21  ;;  %v258_v35 = vand.u32 4294901760, %v178_v29  ;;  %v167_v36 = vsel %vm164_vm4, 1.0, %v132_v24  ;;  %v147_v37 = vmul.f32 0.03125, %v144_v30 }
  0xa0   :  { %v160_v47 = vpop.xlane.xlu0 %159  ;;  %v2112_v17 = vsub.f32 %v231_v1, %v231_v1  ;;  %v2131_v30 = vsel %vm76_vm14, 1.0, %v1872_v25 }
  0xa1   :  { %v2074_v55 = vpack.c.bf16 %v258_v35, %v255_v21  ;;  %v2076_v56 = vsub.f32 %v178_v29, %v258_v35  ;;  %v171_v57 = vsel %vm168_vm5, %v167_v36, %v147_v37  ;;  %v163_v59 = vmul.f32 0.0625, %v160_v47 }
  0xa2   :  { %v485_v60 = vand.u32 4294901760, %v2061_v34  ;;  %v237_v21 = vsel %vm205_vm3, %v2099_v8, 0  ;;  %v375_v35 = vsub.f32 %v2070_v53, %v374_v13  ;;  %v394_v36 = vand.u32 4294901760, %v2106_v14 }
  0xa3   :  { %v175_v2 = vsel %vm172_vm6, %v171_v57, %v163_v59  ;;  %1768 = vmatprep.subr.bf16.mxu1 %v2074_v55  ;;  %1780 = vmatprep.subr.bf16.mxu0 %v2074_v55  ;;  %v492_v5 = vand.u32 4294901760, %v2076_v56  ;;  %v2143_v37 = vsel %vm77_vm15, 1.0, %v1872_v25  ;;  %v404_v52 = vand.u32 4294901760, %v2112_v17 }
  0xa4   :  { %v179_v9 = vsel %vm176_vm2, %v175_v2, 0.0  ;;  %1770 = vmatpush3.bf16.msra.mxu1 %v2074_v55  ;;  %1782 = vmatpush3.bf16.msra.mxu0 %v2074_v55  ;;  %v486_v12 = vsub.f32 %v2061_v34, %v485_v60  ;;  %v366_v57 = vand.u32 4294901760, %v365_v18  ;;  %v2153_v59 = vsub.f32 %v237_v21, %v237_v21 }
  0xa5   :  { %v2108_v39 = vand.u32 4294901760, %v179_v9  ;;  %v493_v16 = vsub.f32 %v2076_v56, %v492_v5  ;;  %v1783_v32 = vpack.c.bf16 %v492_v5, %v485_v60  ;;  %v240_v42 = vsel %vm205_vm3, %v2131_v30, 0 }
  0xa6   :  { %v487_v24 = vand.u32 4294901760, %v486_v12  ;;  %v376_v60 = vand.u32 4294901760, %v375_v35  ;;  %v395_v1 = vsub.f32 %v2106_v14, %v394_v36  ;;  %v2176_v2 = vsel %vm79_vm1, 1.0, %v1872_v25 }
  0xa7   :  { %v2123_v22 = vsub.f32 %v179_v9, %v2108_v39  ;;  %1591 = vmatprep.subr.mxu1 %v2108_v39  ;;  %1681 = vmatprep.subr.mxu0 %v2108_v39  ;;  %v494_v29 = vand.u32 4294901760, %v493_v16  ;;  %v405_v5 = vsub.f32 %v2112_v17, %v404_v52  ;;  %v414_v9 = vand.u32 4294901760, %v2151_v38 }
  0xa8   :  { %1592 = vmatpush3.msra.mxu1 %v2108_v39  ;;  %1682 = vmatpush3.msra.mxu0 %v2108_v39  ;;  %v2182_v12 = vsub.f32 %v240_v42, %v240_v42  ;;  %v424_v16 = vand.u32 4294901760, %v2153_v59  ;;  %v396_v21 = vand.u32 4294901760, %v395_v1 }
  0xa9   :  { %1594 = vmatmul.mubr.f32.vlgmr.msra.gmra.mrb[0].mxu1 %v336_v10  ;;  %1684 = vmatmul.mubr.f32.vlgmr.msra.gmra.mrb[0].mxu0 %v334_v54  ;;  %v1771_v41 = vpack.c.bf16 %v494_v29, %v487_v24  ;;  %v499_v47 = vand.u32 4294901760, %v2123_v22  ;;  %v385_v54 = vsub.f32 %v2081_v0, %v384_v19  ;;  %v243_v10 = vsel %vm205_vm3, %v2143_v37, 0 }
  0xaa   :  { %1784 = vmatprep.subr.bf16.mxu0 %v1783_v32  ;;  %1596 = vmatprep.mubr.f32.mxu1 %v346_v50  ;;  %v2167_v50 = vsel %vm78_vm0, 1.0, %v1872_v25  ;;  %v2187_v44 = vsub.f32 %v243_v10, %v243_v10  ;;  %v406_v24 = vand.u32 4294901760, %v405_v5  ;;  %v415_v29 = vsub.f32 %v2151_v38, %v414_v9  ;;  %v192_v25 = vld [vmem:[%s2542_s3 + $0x18] sm:$0xff] }
  0xab   :  { %1786 = vmatpush3.bf16.msra.mxu0 %v1783_v32  ;;  %1772 = vmatprep.subr.bf16.mxu1 %v1771_v41  ;;  %v500_v62 = vsub.f32 %v2123_v22, %v499_v47  ;;  %v246_v18 = vsel %vm205_vm3, %v2167_v50, 0  ;;  %v434_v32 = vand.u32 4294901760, %v2182_v12  ;;  %v425_v23 = vsub.f32 %v2153_v59, %v424_v16 }
  0xac   :  { %1711 = vmatprep.subr.mxu0 %v499_v47  ;;  %1774 = vmatpush3.bf16.msra.mxu1 %v1771_v41  ;;  %v2206_v35 = vsub.f32 %v246_v18, %v246_v18  ;;  %v444_v45 = vand.u32 4294901760, %v2187_v44 }
  0xad   :  { %1686 = vmatprep.mubr.f32.mxu0 %v344_v3  ;;  %1597 = vmatmul.mubr.f32.gmra.mrb[2].mxu1 %v356_v40  ;;  %v501_v43 = vand.u32 4294901760, %v500_v62  ;;  %v386_v3 = vand.u32 4294901760, %v385_v54  ;;  %v249_v40 = vsel %vm205_vm3, %v2176_v2, 0  ;;  %v435_v41 = vsub.f32 %v2182_v12, %v434_v32 }
  0xae   :  { %1687 = vmatmul.mubr.f32.gmra.mrb[2].mxu0 %v354_v11  ;;  %1599 = vmatprep.mubr.f32.mxu1 %v366_v57  ;;  %v1775_v11 = vpack.c.bf16 %v2076_v56, %v2061_v34  ;;  %v2212_v34 = vsub.f32 %v249_v40, %v249_v40  ;;  %v252_v56 = vsel %vm205_vm3, %v2197_v20, 0  ;;  %v426_v57 = vand.u32 4294901760, %v425_v23 }
  0xaf   :  { %1712 = vmatpush3.msra.mxu0 %v499_v47  ;;  %1621 = vmatprep.subr.mxu1 %v501_v43  ;;  %v454_v47 = vand.u32 4294901760, %v2206_v35  ;;  %v445_v42 = vsub.f32 %v2187_v44, %v444_v45 }
  0xb0   :  { %1788 = vmatprep.subr.bf16.mxu0 %v2074_v55  ;;  %1622 = vmatpush3.msra.mxu1 %v501_v43  ;;  %v464_v62 = vand.u32 4294901760, %v2212_v34 }
  0xb1   :  { %1689 = vmatprep.mubr.f32.mxu0 %v364_v61  ;;  %1600 = vmatmul.mubr.f32.gmra.mrb[4].mxu1 %v376_v60  ;;  %v416_v61 = vand.u32 4294901760, %v415_v29  ;;  %v455_v54 = vsub.f32 %v2206_v35, %v454_v47  ;;  %v446_v60 = vand.u32 4294901760, %v445_v42  ;;  %v198_v29 = vld [vmem:[%s2542_s3 + $0x48] sm:$0xff] }
  0xb2   :  { %1776 = vmatprep.subr.bf16.mxu1 %v1775_v11  ;;  %1690 = vmatmul.mubr.f32.gmra.mrb[4].mxu0 %v374_v13  ;;  %v2220_v13 = vsub.f32 %v252_v56, %v252_v56  ;;  %v465_v1 = vsub.f32 %v2212_v34, %v464_v62 }
  0xb3   :  { %1602 = vmatprep.mubr.f32.mxu1 %v386_v3  ;;  %1692 = vmatprep.mubr.f32.mxu0 %v384_v19  ;;  %v436_v19 = vand.u32 4294901760, %v435_v41  ;;  %v195_v3 = vld [vmem:[%s2542_s3 + $0x30] sm:$0xff] }
  0xb4   :  { %v474_v10 = vand.u32 4294901760, %v2220_v13  ;;  %v466_v5 = vand.u32 4294901760, %v465_v1 }
  0xb5   :  { %1603 = vmatmul.mubr.f32.gmra.mrb[6].mxu1 %v396_v21 }
  0xb6   :  { %1693 = vmatmul.mubr.f32.gmra.mrb[6].mxu0 %v394_v36  ;;  %1605 = vmatprep.mubr.f32.mxu1 %v406_v24  ;;  %v456_v36 = vand.u32 4294901760, %v455_v54  ;;  %v475_v43 = vsub.f32 %v2220_v13, %v474_v10 }
  0xb7   :  { %1695 = vmatprep.mubr.f32.mxu0 %v404_v52 }
  0xb8   :  { %v476_v52 = vand.u32 4294901760, %v475_v43  ;;  %v202_v43 = vld [vmem:[%s2542_s3 + $0x68] sm:$0xff] }
  0xb9   :  { %1606 = vmatmul.mubr.f32.gmra.mrb[8].mxu1 %v416_v61 }
  0xba   :  { %1696 = vmatmul.mubr.f32.gmra.mrb[8].mxu0 %v414_v9  ;;  %1608 = vmatprep.mubr.f32.mxu1 %v426_v57 }
  0xbb   :  { %1698 = vmatprep.mubr.f32.mxu0 %v424_v16 }
  0xbd   :  { %1609 = vmatmul.mubr.f32.gmra.mrb[10].mxu1 %v436_v19  ;;  %v199_v19 = vld [vmem:[%s2542_s3 + $0x50] sm:$0xff] }
  0xbe   :  { %1699 = vmatmul.mubr.f32.gmra.mrb[10].mxu0 %v434_v32  ;;  %1611 = vmatprep.mubr.f32.mxu1 %v446_v60 }
  0xbf   :  { %1701 = vmatprep.mubr.f32.mxu0 %v444_v45  ;;  %v197_v45 = vld [vmem:[%s2542_s3 + $0x40] sm:$0xff] }
  0xc1   :  { %1612 = vmatmul.mubr.f32.gmra.mrb[12].mxu1 %v456_v36 }
  0xc2   :  { %1702 = vmatmul.mubr.f32.gmra.mrb[12].mxu0 %v454_v47  ;;  %1614 = vmatprep.mubr.f32.mxu1 %v466_v5 }
  0xc3   :  { %1704 = vmatprep.mubr.f32.mxu0 %v464_v62 }
  0xc5   :  { %1615 = vmatmul.mubr.f32.gmra.mrb[14].mxu1 %v476_v52 }
  0xc6   :  { %1705 = vmatmul.mubr.f32.gmra.mrb[14].mxu0 %v474_v10  ;;  %1623 = vmatprep.mubr.msk.f32.mxu1 %vm205_vm3, %v1927_v26 }
  0xc7   :  { %1713 = vmatprep.mubr.msk.f32.mxu0 %vm205_vm3, %v1927_v26 }
  0xc9   :  { %1624 = vmatmul.mubr.msk.f32.vlgmr.msra.gmra.mrb[0].mxu1 %vm205_vm3, %v1980_v46 }
  0xca   :  { %1778 = vmatpush3.bf16.msra.mxu1 %v1775_v11  ;;  %1714 = vmatmul.mubr.msk.f32.vlgmr.msra.gmra.mrb[0].mxu0 %vm205_vm3, %v1980_v46 }
  0xcb   :  { %1790 = vmatpush3.bf16.msra.mxu0 %v2074_v55  ;;  %1651 = vmatprep.subr.mxu1 %v2123_v22 }
  0xcc   :  { %1741 = vmatprep.subr.mxu0 %v2108_v39  ;;  %1626 = vmatprep.mubr.msk.f32.mxu1 %vm205_vm3, %v1989_v49 }
  0xcd   :  { %1716 = vmatprep.mubr.msk.f32.mxu0 %vm205_vm3, %v1989_v49  ;;  %1627 = vmatmul.mubr.msk.f32.gmra.mrb[2].mxu1 %vm205_vm3, %v1994_v51 }
  0xce   :  { %1652 = vmatpush3.msra.mxu1 %v2123_v22  ;;  %1717 = vmatmul.mubr.msk.f32.gmra.mrb[2].mxu0 %vm205_vm3, %v1994_v51 }
  0xcf   :  { %1742 = vmatpush3.msra.mxu0 %v2108_v39  ;;  %1629 = vmatprep.mubr.msk.f32.mxu1 %vm205_vm3, %v2015_v4  ;;  %v194_v39 = vld [vmem:[%s2542_s3 + $0x28] sm:$0xff] }
  0xd0   :  { %1719 = vmatprep.mubr.msk.f32.mxu0 %vm205_vm3, %v2015_v4 }
  0xd1   :  { %1630 = vmatmul.mubr.msk.f32.gmra.mrb[4].mxu1 %vm205_vm3, %v2021_v7 }
  0xd2   :  { %1720 = vmatmul.mubr.msk.f32.gmra.mrb[4].mxu0 %vm205_vm3, %v2021_v7  ;;  %1632 = vmatprep.mubr.msk.f32.mxu1 %vm205_vm3, %v2032_v15 }
  0xd3   :  { %1722 = vmatprep.mubr.msk.f32.mxu0 %vm205_vm3, %v2032_v15 }
  0xd5   :  { %1633 = vmatmul.mubr.msk.f32.gmra.mrb[6].mxu1 %vm205_vm3, %v2048_v27 }
  0xd6   :  { %1723 = vmatmul.mubr.msk.f32.gmra.mrb[6].mxu0 %vm205_vm3, %v2048_v27  ;;  %1635 = vmatprep.mubr.msk.f32.mxu1 %vm205_vm3, %v2059_v33 }
  0xd7   :  { %1725 = vmatprep.mubr.msk.f32.mxu0 %vm205_vm3, %v2059_v33 }
  0xd9   :  { %1636 = vmatmul.mubr.msk.f32.gmra.mrb[8].mxu1 %vm205_vm3, %v2093_v6 }
  0xda   :  { %1726 = vmatmul.mubr.msk.f32.gmra.mrb[8].mxu0 %vm205_vm3, %v2093_v6  ;;  %1638 = vmatprep.mubr.msk.f32.mxu1 %vm205_vm3, %v2099_v8 }
  0xdb   :  { %1728 = vmatprep.mubr.msk.f32.mxu0 %vm205_vm3, %v2099_v8 }
  0xdd   :  { %1639 = vmatmul.mubr.msk.f32.gmra.mrb[10].mxu1 %vm205_vm3, %v2131_v30 }
  0xde   :  { %1729 = vmatmul.mubr.msk.f32.gmra.mrb[10].mxu0 %vm205_vm3, %v2131_v30  ;;  %1641 = vmatprep.mubr.msk.f32.mxu1 %vm205_vm3, %v2143_v37 }
  0xdf   :  { %1731 = vmatprep.mubr.msk.f32.mxu0 %vm205_vm3, %v2143_v37 }
  0xe1   :  { %1642 = vmatmul.mubr.msk.f32.gmra.mrb[12].mxu1 %vm205_vm3, %v2167_v50 }
  0xe2   :  { %1732 = vmatmul.mubr.msk.f32.gmra.mrb[12].mxu0 %vm205_vm3, %v2167_v50  ;;  %1644 = vmatprep.mubr.msk.f32.mxu1 %vm205_vm3, %v2176_v2 }
  0xe3   :  { %1734 = vmatprep.mubr.msk.f32.mxu0 %vm205_vm3, %v2176_v2 }
  0xe5   :  { %1645 = vmatmul.mubr.msk.f32.gmra.mrb[14].mxu1 %vm205_vm3, %v2197_v20 }
  0xe6   :  { %1735 = vmatmul.mubr.msk.f32.gmra.mrb[14].mxu0 %vm205_vm3, %v2197_v20  ;;  %1653 = vmatprep.mubr.f32.mxu1 %v1932_v28  ;;  %v190_v28 = vld [vmem:[%s2542_s3 + $0x8] sm:$0xff] }
  0xe7   :  { %1743 = vmatprep.mubr.msk.f32.mxu0 %vm205_vm3, %v1927_v26 }
  0xe9   :  { %1654 = vmatmul.mubr.f32.vlgmr.msra.gmra.mrb[0].mxu1 %v1984_v48 }
  0xea   :  { %1744 = vmatmul.mubr.msk.f32.vlgmr.msra.gmra.mrb[0].mxu0 %vm205_vm3, %v1980_v46  ;;  %1656 = vmatprep.mubr.f32.mxu1 %v2001_v58 }
  0xeb   :  { %1746 = vmatprep.mubr.msk.f32.mxu0 %vm205_vm3, %v1989_v49 }
  0xed   :  { %1657 = vmatmul.mubr.f32.gmra.mrb[2].mxu1 %v2008_v63 }
  0xee   :  { %1747 = vmatmul.mubr.msk.f32.gmra.mrb[2].mxu0 %vm205_vm3, %v1994_v51  ;;  %1659 = vmatprep.mubr.f32.mxu1 %v2051_v31  ;;  %v189_v51 = vld [vmem:[%s2542_s3] sm:$0xff] }
  0xef   :  { %1749 = vmatprep.mubr.msk.f32.mxu0 %vm205_vm3, %v2015_v4 }
  0xf1   :  { %1660 = vmatmul.mubr.f32.gmra.mrb[4].mxu1 %v2070_v53  ;;  %v191_v53 = vld [vmem:[%s2542_s3 + $0x10] sm:$0xff] }
  0xf2   :  { %1750 = vmatmul.mubr.msk.f32.gmra.mrb[4].mxu0 %vm205_vm3, %v2021_v7  ;;  %1662 = vmatprep.mubr.f32.mxu1 %v2081_v0 }
  0xf3   :  { %1752 = vmatprep.mubr.msk.f32.mxu0 %vm205_vm3, %v2032_v15 }
  0xf5   :  { %1663 = vmatmul.mubr.f32.gmra.mrb[6].mxu1 %v2106_v14 }
  0xf6   :  { %1753 = vmatmul.mubr.msk.f32.gmra.mrb[6].mxu0 %vm205_vm3, %v2048_v27  ;;  %1665 = vmatprep.mubr.f32.mxu1 %v2112_v17 }
  0xf7   :  { %1755 = vmatprep.mubr.msk.f32.mxu0 %vm205_vm3, %v2059_v33 }
  0xf9   :  { %1666 = vmatmul.mubr.f32.gmra.mrb[8].mxu1 %v2151_v38 }
  0xfa   :  { %1756 = vmatmul.mubr.msk.f32.gmra.mrb[8].mxu0 %vm205_vm3, %v2093_v6  ;;  %1668 = vmatprep.mubr.f32.mxu1 %v2153_v59 }
  0xfb   :  { %1758 = vmatprep.mubr.msk.f32.mxu0 %vm205_vm3, %v2099_v8 }
  0xfd   :  { %1669 = vmatmul.mubr.f32.gmra.mrb[10].mxu1 %v2182_v12  ;;  %v196_v12 = vld [vmem:[%s2542_s3 + $0x38] sm:$0xff] }
  0xfe   :  { %1759 = vmatmul.mubr.msk.f32.gmra.mrb[10].mxu0 %vm205_vm3, %v2131_v30  ;;  %1671 = vmatprep.mubr.f32.mxu1 %v2187_v44 }
  0xff   :  { %1761 = vmatprep.mubr.msk.f32.mxu0 %vm205_vm3, %v2143_v37  ;;  %v193_v37 = vld [vmem:[%s2542_s3 + $0x20] sm:$0xff] }
 0x101   :  { %1672 = vmatmul.mubr.f32.gmra.mrb[12].mxu1 %v2206_v35 }
 0x102   :  { %1762 = vmatmul.mubr.msk.f32.gmra.mrb[12].mxu0 %vm205_vm3, %v2167_v50  ;;  %1674 = vmatprep.mubr.f32.mxu1 %v2212_v34 }
 0x103   :  { %1764 = vmatprep.mubr.msk.f32.mxu0 %vm205_vm3, %v2176_v2 }
 0x105   :  { %1675 = vmatmul.mubr.f32.gmra.mrb[14].mxu1 %v2220_v13  ;;  %v200_v13 = vld [vmem:[%s2542_s3 + $0x58] sm:$0xff] }
 0x106   :  { %1765 = vmatmul.mubr.msk.f32.gmra.mrb[14].mxu0 %vm205_vm3, %v2197_v20 }
 0x1bc   :  { %v1655_v26 = vpop.f32.mrb[0].mxu1 }
 0x1bd   :  { %v1745_v46 = vpop.f32.mrb[0].mxu0  ;;  %v732_v48 = vpop.f32.mrb[1].mxu1 }
 0x1be   :  { %v1791_v49 = vadd.f32 %v1745_v46, %v1655_v26  ;;  %v1277_v58 = vpop.f32.mrb[1].mxu0 }
 0x1bf   :  { %v1792_v63 = vadd.f32 %v1277_v58, %v732_v48 }
 0x1c0   :  { %v1372_v4 = vadd.f32 %v1791_v49, %v190_v28  ;;  %v1658_v7 = vpop.f32.mrb[2].mxu1  ;;  %v201_v28 = vld [vmem:[%s2542_s3 + $0x60] sm:$0xff] }
 0x1c1   :  { %v1371_v15 = vadd.f32 %v1792_v63, %v189_v51  ;;  %v1748_v27 = vpop.f32.mrb[2].mxu0  ;;  %v746_v31 = vpop.f32.mrb[3].mxu1  ;;  %v204_v63 = vld [vmem:[%s2542_s3 + $0x78] sm:$0xff] }
 0x1c2   :  { %1389 = vst.msk [vmem:[%s2542_s3 + $0x8] sm:$0xff] %vm18_vm8, %v1372_v4  ;;  %v1793_v33 = vadd.f32 %v1748_v27, %v1658_v7  ;;  %v1289_v55 = vpop.f32.mrb[3].mxu0 }
 0x1c3   :  { %1388 = vst.msk [vmem:[%s2542_s3] sm:$0xff] %vm18_vm8, %v1371_v15  ;;  %v1794_v0 = vadd.f32 %v1289_v55, %v746_v31 }
 0x1c4   :  { %v1374_v6 = vadd.f32 %v1793_v33, %v192_v25  ;;  %v1661_v8 = vpop.f32.mrb[4].mxu1  ;;  %v203_v25 = vld [vmem:[%s2542_s3 + $0x70] sm:$0xff] }
 0x1c5   :  { %v1373_v14 = vadd.f32 %v1794_v0, %v191_v53  ;;  %v1751_v17 = vpop.f32.mrb[4].mxu0  ;;  %v760_v22 = vpop.f32.mrb[5].mxu1 }
 0x1c6   :  { %1391 = vst.msk [vmem:[%s2542_s3 + $0x18] sm:$0xff] %vm18_vm8, %v1374_v6  ;;  %v1795_v30 = vadd.f32 %v1751_v17, %v1661_v8  ;;  %v1301_v38 = vpop.f32.mrb[5].mxu0 }
 0x1c7   :  { %1390 = vst.msk [vmem:[%s2542_s3 + $0x10] sm:$0xff] %vm18_vm8, %v1373_v14  ;;  %v1796_v59 = vadd.f32 %v1301_v38, %v760_v22 }
 0x1c8   :  { %v1376_v50 = vadd.f32 %v1795_v30, %v194_v39  ;;  %v1664_v2 = vpop.f32.mrb[6].mxu1 }
 0x1c9   :  { %v1375_v9 = vadd.f32 %v1796_v59, %v193_v37  ;;  %v1754_v16 = vpop.f32.mrb[6].mxu0  ;;  %v774_v44 = vpop.f32.mrb[7].mxu1 }
 0x1ca   :  { %1393 = vst.msk [vmem:[%s2542_s3 + $0x28] sm:$0xff] %vm18_vm8, %v1376_v50  ;;  %v1797_v18 = vadd.f32 %v1754_v16, %v1664_v2  ;;  %v1313_v40 = vpop.f32.mrb[7].mxu0 }
 0x1cb   :  { %1392 = vst.msk [vmem:[%s2542_s3 + $0x20] sm:$0xff] %vm18_vm8, %v1375_v9  ;;  %v1798_v20 = vadd.f32 %v1313_v40, %v774_v44 }
 0x1cc   :  { %v1378_v11 = vadd.f32 %v1797_v18, %v196_v12  ;;  %v1667_v21 = vpop.f32.mrb[8].mxu1 }
 0x1cd   :  { %v1377_v24 = vadd.f32 %v1798_v20, %v195_v3  ;;  %v1757_v32 = vpop.f32.mrb[8].mxu0  ;;  %v788_v35 = vpop.f32.mrb[9].mxu1 }
 0x1ce   :  { %1395 = vst.msk [vmem:[%s2542_s3 + $0x38] sm:$0xff] %vm18_vm8, %v1378_v11  ;;  %v1799_v23 = vadd.f32 %v1757_v32, %v1667_v21  ;;  %v1325_v34 = vpop.f32.mrb[9].mxu0 }
 0x1cf   :  { %1394 = vst.msk [vmem:[%s2542_s3 + $0x30] sm:$0xff] %vm18_vm8, %v1377_v24  ;;  %v1800_v56 = vadd.f32 %v1325_v34, %v788_v35 }
 0x1d0   :  { %v1380_v61 = vadd.f32 %v1799_v23, %v198_v29  ;;  %v1670_v41 = vpop.f32.mrb[10].mxu1 }
 0x1d1   :  { %v1379_v47 = vadd.f32 %v1800_v56, %v197_v45  ;;  %v1760_v57 = vpop.f32.mrb[10].mxu0  ;;  %v802_v42 = vpop.f32.mrb[11].mxu1 }
 0x1d2   :  { %1397 = vst.msk [vmem:[%s2542_s3 + $0x48] sm:$0xff] %vm18_vm8, %v1380_v61  ;;  %v1801_v62 = vadd.f32 %v1760_v57, %v1670_v41  ;;  %v1337_v54 = vpop.f32.mrb[11].mxu0 }
 0x1d3   :  { %1396 = vst.msk [vmem:[%s2542_s3 + $0x40] sm:$0xff] %vm18_vm8, %v1379_v47  ;;  %v1802_v10 = vadd.f32 %v1337_v54, %v802_v42 }
 0x1d4   :  { %v1382_v60 = vadd.f32 %v1801_v62, %v200_v13  ;;  %v1673_v1 = vpop.f32.mrb[12].mxu1 }
 0x1d5   :  { %v1381_v36 = vadd.f32 %v1802_v10, %v199_v19  ;;  %v1763_v5 = vpop.f32.mrb[12].mxu0  ;;  %v816_v52 = vpop.f32.mrb[13].mxu1 }
 0x1d6   :  { %1399 = vst.msk [vmem:[%s2542_s3 + $0x58] sm:$0xff] %vm18_vm8, %v1382_v60  ;;  %v1803_v26 = vadd.f32 %v1763_v5, %v1673_v1  ;;  %v1349_v46 = vpop.f32.mrb[13].mxu0 }
 0x1d7   :  { %1398 = vst.msk [vmem:[%s2542_s3 + $0x50] sm:$0xff] %vm18_vm8, %v1381_v36  ;;  %v1804_v48 = vadd.f32 %v1349_v46, %v816_v52 }
 0x1d8   :  { %v1384_v49 = vadd.f32 %v1803_v26, %v202_v43  ;;  %v1676_v51 = vpop.f32.mrb[14].mxu1 }
 0x1d9   :  { %v1383_v58 = vadd.f32 %v1804_v48, %v201_v28  ;;  %v1766_v4 = vpop.f32.mrb[14].mxu0  ;;  %v830_v7 = vpop.f32.mrb[15].mxu1 }
 0x1da   :  { %1401 = vst.msk [vmem:[%s2542_s3 + $0x68] sm:$0xff] %vm18_vm8, %v1384_v49  ;;  %v1805_v15 = vadd.f32 %v1766_v4, %v1676_v51  ;;  %v1361_v27 = vpop.f32.mrb[15].mxu0 }
 0x1db   :  { %1400 = vst.msk [vmem:[%s2542_s3 + $0x60] sm:$0xff] %vm18_vm8, %v1383_v58  ;;  %v1806_v31 = vadd.f32 %v1361_v27, %v830_v7 }
 0x1dc   :  { %v1386_v33 = vadd.f32 %v1805_v15, %v204_v63 }
 0x1dd   :  { %v1385_v53 = vadd.f32 %v1806_v31, %v203_v25 }
 0x1de   :  { %1403 = vst.msk [vmem:[%s2542_s3 + $0x78] sm:$0xff] %vm18_vm8, %v1386_v33 }
 0x1df   :  { %1402 = vst.msk [vmem:[%s2542_s3 + $0x70] sm:$0xff] %vm18_vm8, %v1385_v53 }

// kernel: equiv_layer_norm.3
= control target key start
LH: loop header
LB: loop body
LE: loop exit
PB: predicated region body
PF: predicated region fallthrough
CT: control target
= control target key end

     0   :  { %s3290_s0 = inlined_call_operand.vmem [shape: f32[1,128,8], index: 0, kind: input, shape index: {}]   ;;  %s3291_s1 = inlined_call_operand.vmem [shape: s32[24,1], index: 1, kind: input, shape index: {}]   ;;  %s3292_s2 = inlined_call_operand.vmem [shape: f32[24,32], index: 2, kind: input, shape index: {}]   ;;  %s3293_s3 = inlined_call_operand.vmem [shape: f32[24,48], index: 3, kind: input, shape index: {}]   ;;  %s3294_s4 = inlined_call_operand.vmem [shape: f32[1,32], index: 4, kind: input, shape index: {}]   ;;  %s3295_s5 = inlined_call_operand.vmem [shape: f32[1,32], index: 5, kind: input, shape index: {}]   ;;  %s3296_s6 = inlined_call_operand.hbm [shape: f32[24,32], index: 6, kind: output, shape index: {0}]   ;;  %s3297_s7 = inlined_call_operand.vmem [shape: f32[24,48], index: 7, kind: output, shape index: {1}]  }
   0x1   :  { %v2346_v0 = vld [vmem:[%s3290_s0 + $0x10] sm:$0xff]  ;;  %v2351_v1 = vld [vmem:[%s3290_s0] sm:$0xff]  ;;  %v2356_v2 = vld [vmem:[%s3290_s0 + $0x18] sm:$0xff] }
   0x2   :  { %v60_v3 = vmax.f32 %v2346_v0, 1.0  ;;  %v58_v4 = vmax.f32 %v2351_v1, 1.0  ;;  %v61_v5 = vmax.f32 %v2356_v2, 1.0  ;;  %v2364_v6 = vld [vmem:[%s3290_s0 + $0x8] sm:$0xff]  ;;  %v2375_v9 = vld [vmem:[%s3290_s0 + $0x20] sm:$0xff]  ;;  %v2382_v12 = vld [vmem:[%s3290_s0 + $0x38] sm:$0xff] }
   0x3   :  { %v59_v7 = vmax.f32 %v2364_v6, 1.0  ;;  %v2370_v8 = vld [vmem:[%s3290_s0 + $0x28] sm:$0xff]  ;;  %v62_v11 = vmax.f32 %v2375_v9, 1.0 }
   0x4   :  { %2169 = vrcp.f32 %v60_v3  ;;  %v63_v10 = vmax.f32 %v2370_v8, 1.0 }
   0x5   :  { %2171 = vrcp.f32 %v58_v4 }
   0x6   :  { %2173 = vrcp.f32 %v61_v5 }
   0x7   :  { %2175 = vrcp.f32 %v59_v7 }
   0x8   :  { %13 = vsyncpa [#allocation3], 0  ;;  %v2387_v13 = vld [vmem:[%s3290_s0 + $0x30] sm:$0xff]  ;;  %2177 = vrcp.f32 %v63_v10  ;;  %v65_v14 = vmax.f32 %v2382_v12, 1.0  ;;  %v2394_v16 = vld [vmem:[%s3290_s0 + $0x48] sm:$0xff]  ;;  %s2289_s21 = smov 1  }
   0x9   :  { %2179 = vrcp.f32 %v62_v11  ;;  %v64_v15 = vmax.f32 %v2387_v13, 1.0  ;;  %v2399_v17 = vld [vmem:[%s3290_s0 + $0x40] sm:$0xff]  ;;  %v67_v19 = vmax.f32 %v2394_v16, 1.0  ;;  %v2410_v22 = vld [vmem:[%s3290_s0 + $0x58] sm:$0xff]  ;;  %v2416_v24 = vld [vmem:[%s3290_s0 + $0x50] sm:$0xff]  ;;  %s2291_s11 = smov 3  }
   0xa   :  { %2181 = vrcp.f32 %v65_v14  ;;  %v66_v21 = vmax.f32 %v2399_v17, 1.0  ;;  %v69_v26 = vmax.f32 %v2410_v22, 1.0  ;;  %v68_v27 = vmax.f32 %v2416_v24, 1.0  ;;  %v2424_v28 = vld [vmem:[%s3290_s0 + $0x68] sm:$0xff]  ;;  %v2430_v30 = vld [vmem:[%s3290_s0 + $0x60] sm:$0xff]  ;;  %v2438_v34 = vld [vmem:[%s3290_s0 + $0x78] sm:$0xff] }
   0xb   :  { %2183 = vrcp.f32 %v64_v15  ;;  %v71_v32 = vmax.f32 %v2424_v28, 1.0  ;;  %v70_v33 = vmax.f32 %v2430_v30, 1.0  ;;  %v2444_v36 = vld [vmem:[%s3290_s0 + $0x70] sm:$0xff]  ;;  %v73_v38 = vmax.f32 %v2438_v34, 1.0  ;;  %s2290_s0 = smov 2   ;;  %s2293_s12 = smov 127  }
   0xc   :  { %2185 = vrcp.f32 %v67_v19  ;;  %v72_v39 = vmax.f32 %v2444_v36, 1.0  ;;  %v2292_v48 = vmov 0   ;;  %vm2295_vm0 = vmmov 0   ;;  %s2300_s30 = smov [#allocation2]  }
   0xd   :  { %2187 = vrcp.f32 %v66_v21  ;;  %2160 = vset.pattern.permute.xlu0 %v2292_v48  ;;  %2161 = vset.pattern.permute.xlu1 %v2292_v48  ;;  %vm698_vm1 = vcmask 7168   ;;  %vm715_vm2 = vcmask 15360   ;;  %vm732_vm3 = vcmask 23552  }
   0xe   :  { %v2401_v18 = vpop.eup %2169  ;;  %2189 = vrcp.f32 %v69_v26  ;;  %vm1558_vm7 = vcmask 261120   ;;  %vm1577_vm8 = vcmask 392192  }
   0xf   :  { %v2172_v20 = vpop.eup %2171  ;;  %126 = vrot.lane.b32.xlu1 %v2401_v18, %s2289_s21  ;;  %2191 = vrcp.f32 %v68_v27 }
  0x10   :  { %v2174_v23 = vpop.eup %2173  ;;  %122 = vrot.lane.b32.xlu0 %v2172_v20, %s2289_s21  ;;  %2193 = vrcp.f32 %v71_v32 }
  0x11   :  { %v2176_v25 = vpop.eup %2175  ;;  %2195 = vrcp.f32 %v70_v33 }
  0x12   :  { %v2178_v29 = vpop.eup %2177  ;;  %2197 = vrcp.f32 %v73_v38 }
  0x13   :  { %128 = vrot.lane.b32.xlu1 %v2174_v23, %s2289_s21  ;;  %v2180_v31 = vpop.eup %2179  ;;  %2199 = vrcp.f32 %v72_v39 }
  0x14   :  { %124 = vrot.lane.b32.xlu0 %v2176_v25, %s2289_s21  ;;  %v2182_v35 = vpop.eup %2181 }
  0x15   :  { %v2184_v37 = vpop.eup %2183 }
  0x16   :  { %v2186_v40 = vpop.eup %2185 }
  0x17   :  { %132 = vrot.lane.b32.xlu1 %v2178_v29, %s2289_s21  ;;  %v2188_v41 = vpop.eup %2187 }
  0x18   :  { %130 = vrot.lane.b32.xlu0 %v2180_v31, %s2289_s21  ;;  %v2190_v42 = vpop.eup %2189 }
  0x19   :  { %v2192_v43 = vpop.eup %2191 }
  0x1a   :  { %v2194_v44 = vpop.eup %2193 }
  0x1b   :  { %136 = vrot.lane.b32.xlu1 %v2182_v35, %s2289_s21  ;;  %v2196_v45 = vpop.eup %2195 }
  0x1c   :  { %134 = vrot.lane.b32.xlu0 %v2184_v37, %s2289_s21  ;;  %v2198_v46 = vpop.eup %2197 }
  0x1d   :  { %v2200_v47 = vpop.eup %2199 }
  0x1f   :  { %140 = vrot.lane.b32.xlu1 %v2186_v40, %s2289_s21 }
  0x20   :  { %138 = vrot.lane.b32.xlu0 %v2188_v41, %s2289_s21 }
  0x23   :  { %144 = vrot.lane.b32.xlu1 %v2190_v42, %s2289_s21 }
  0x24   :  { %142 = vrot.lane.b32.xlu0 %v2192_v43, %s2289_s21 }
  0x27   :  { %148 = vrot.lane.b32.xlu1 %v2194_v44, %s2289_s21 }
  0x28   :  { %146 = vrot.lane.b32.xlu0 %v2196_v45, %s2289_s21 }
  0x2b   :  { %152 = vrot.lane.b32.xlu1 %v2198_v46, %s2289_s21 }
  0x2c   :  { %150 = vrot.lane.b32.xlu0 %v2200_v47, %s2289_s21 }
  0x2f   :  { %188 = vrot.lane.b32.xlu1 %v2176_v25, %s2290_s0 }
  0x30   :  { %186 = vrot.lane.b32.xlu0 %v2172_v20, %s2290_s0 }
  0x33   :  { %364 = vrot.lane.b32.xlu1 %v2176_v25, %s2291_s11 }
  0x34   :  { %362 = vrot.lane.b32.xlu0 %v2172_v20, %s2291_s11 }
  0x37   :  { %192 = vrot.lane.b32.xlu1 %v2174_v23, %s2290_s0 }
  0x38   :  { %190 = vrot.lane.b32.xlu0 %v2401_v18, %s2290_s0 }
  0x3b   :  { %368 = vrot.lane.b32.xlu1 %v2174_v23, %s2291_s11 }
  0x3c   :  { %366 = vrot.lane.b32.xlu0 %v2401_v18, %s2291_s11 }
  0x3f   :  { %196 = vrot.lane.b32.xlu1 %v2178_v29, %s2290_s0 }
  0x40   :  { %194 = vrot.lane.b32.xlu0 %v2180_v31, %s2290_s0 }
  0x43   :  { %372 = vrot.lane.b32.xlu1 %v2178_v29, %s2291_s11 }
  0x44   :  { %370 = vrot.lane.b32.xlu0 %v2180_v31, %s2291_s11 }
  0x47   :  { %200 = vrot.lane.b32.xlu1 %v2182_v35, %s2290_s0 }
  0x48   :  { %198 = vrot.lane.b32.xlu0 %v2184_v37, %s2290_s0 }
  0x4b   :  { %376 = vrot.lane.b32.xlu1 %v2182_v35, %s2291_s11 }
  0x4c   :  { %374 = vrot.lane.b32.xlu0 %v2184_v37, %s2291_s11 }
  0x4f   :  { %204 = vrot.lane.b32.xlu1 %v2186_v40, %s2290_s0 }
  0x50   :  { %202 = vrot.lane.b32.xlu0 %v2188_v41, %s2290_s0 }
  0x53   :  { %380 = vrot.lane.b32.xlu1 %v2186_v40, %s2291_s11 }
  0x54   :  { %378 = vrot.lane.b32.xlu0 %v2188_v41, %s2291_s11 }
  0x57   :  { %208 = vrot.lane.b32.xlu1 %v2190_v42, %s2290_s0 }
  0x58   :  { %206 = vrot.lane.b32.xlu0 %v2192_v43, %s2290_s0 }
  0x5b   :  { %384 = vrot.lane.b32.xlu1 %v2190_v42, %s2291_s11 }
  0x5c   :  { %382 = vrot.lane.b32.xlu0 %v2192_v43, %s2291_s11 }
  0x5f   :  { %212 = vrot.lane.b32.xlu1 %v2194_v44, %s2290_s0 }
  0x60   :  { %210 = vrot.lane.b32.xlu0 %v2196_v45, %s2290_s0 }
  0x63   :  { %388 = vrot.lane.b32.xlu1 %v2194_v44, %s2291_s11 }
  0x64   :  { %386 = vrot.lane.b32.xlu0 %v2196_v45, %s2291_s11 }
  0x67   :  { %216 = vrot.lane.b32.xlu1 %v2198_v46, %s2290_s0 }
  0x68   :  { %214 = vrot.lane.b32.xlu0 %v2200_v47, %s2290_s0 }
  0x6b   :  { %392 = vrot.lane.b32.xlu1 %v2198_v46, %s2291_s11 }
  0x6c   :  { %390 = vrot.lane.b32.xlu0 %v2200_v47, %s2291_s11 }
  0x81   :  { %v127_v49 = vpop.permute.xlu1 %126 }
  0x82   :  { %v123_v50 = vpop.permute.xlu0 %122  ;;  %v172_v52 = vmul.f32 %v127_v49, %v2346_v0 }
  0x83   :  { %v170_v51 = vmul.f32 %v123_v50, %v2351_v1 }
  0x84   :  { %v252_v63 = vmul.f32 %v172_v52, %v172_v52 }
  0x85   :  { %522 = vrot.lane.b32.xlu0 %v170_v51, %s2293_s12  ;;  %v129_v53 = vpop.permute.xlu1 %128  ;;  %v250_v59 = vmul.f32 %v170_v51, %v170_v51 }
  0x86   :  { %v125_v54 = vpop.permute.xlu0 %124  ;;  %v173_v56 = vmul.f32 %v129_v53, %v2356_v2 }
  0x87   :  { %v171_v55 = vmul.f32 %v125_v54, %v2364_v6 }
  0x88   :  { %v253_v14 = vmul.f32 %v173_v56, %v173_v56 }
  0x89   :  { %526 = vrot.lane.b32.xlu0 %v172_v52, %s2293_s12  ;;  %524 = vrot.lane.b32.xlu1 %v171_v55, %s2293_s12  ;;  %v133_v57 = vpop.permute.xlu1 %132  ;;  %v251_v3 = vmul.f32 %v171_v55, %v171_v55 }
  0x8a   :  { %v131_v58 = vpop.permute.xlu0 %130  ;;  %v2507_v4 = vmul.f32 %v133_v57, %v2370_v8 }
  0x8b   :  { %v2502_v60 = vmul.f32 %v131_v58, %v2375_v9 }
  0x8c   :  { %v255_v18 = vmul.f32 %v2507_v4, %v2507_v4 }
  0x8d   :  { %282 = vrot.lane.b32.xlu0 %v250_v59, %s2289_s21  ;;  %528 = vrot.lane.b32.xlu1 %v173_v56, %s2293_s12  ;;  %v137_v61 = vpop.permute.xlu1 %136  ;;  %v254_v5 = vmul.f32 %v2502_v60, %v2502_v60 }
  0x8e   :  { %v135_v62 = vpop.permute.xlu0 %134  ;;  %v2517_v15 = vmul.f32 %v137_v61, %v2382_v12 }
  0x8f   :  { %v2512_v7 = vmul.f32 %v135_v62, %v2387_v13 }
  0x90   :  { %v257_v25 = vmul.f32 %v2517_v15, %v2517_v15 }
  0x91   :  { %286 = vrot.lane.b32.xlu0 %v252_v63, %s2289_s21  ;;  %284 = vrot.lane.b32.xlu1 %v251_v3, %s2289_s21  ;;  %v141_v10 = vpop.permute.xlu1 %140  ;;  %v256_v19 = vmul.f32 %v2512_v7, %v2512_v7 }
  0x92   :  { %v139_v11 = vpop.permute.xlu0 %138  ;;  %v2531_v26 = vmul.f32 %v141_v10, %v2394_v16 }
  0x93   :  { %v2524_v20 = vmul.f32 %v139_v11, %v2399_v17 }
  0x94   :  { %v259_v35 = vmul.f32 %v2531_v26, %v2531_v26 }
  0x95   :  { %288 = vrot.lane.b32.xlu1 %v253_v14, %s2289_s21  ;;  %290 = vrot.lane.b32.xlu0 %v254_v5, %s2289_s21  ;;  %v145_v21 = vpop.permute.xlu1 %144  ;;  %v258_v27 = vmul.f32 %v2524_v20, %v2524_v20 }
  0x96   :  { %v143_v23 = vpop.permute.xlu0 %142  ;;  %v2541_v33 = vmul.f32 %v145_v21, %v2410_v22 }
  0x97   :  { %v2536_v29 = vmul.f32 %v143_v23, %v2416_v24 }
  0x98   :  { %v261_v41 = vmul.f32 %v2541_v33, %v2541_v33 }
  0x99   :  { %292 = vrot.lane.b32.xlu1 %v255_v18, %s2289_s21  ;;  %294 = vrot.lane.b32.xlu0 %v256_v19, %s2289_s21  ;;  %v149_v31 = vpop.permute.xlu1 %148  ;;  %v260_v37 = vmul.f32 %v2536_v29, %v2536_v29 }
  0x9a   :  { %v147_v32 = vpop.permute.xlu0 %146  ;;  %v2555_v42 = vmul.f32 %v149_v31, %v2424_v28 }
  0x9b   :  { %v2548_v38 = vmul.f32 %v147_v32, %v2430_v30 }
  0x9c   :  { %v263_v47 = vmul.f32 %v2555_v42, %v2555_v42 }
  0x9d   :  { %296 = vrot.lane.b32.xlu1 %v257_v25, %s2289_s21  ;;  %298 = vrot.lane.b32.xlu0 %v258_v27, %s2289_s21  ;;  %v153_v39 = vpop.permute.xlu1 %152  ;;  %v262_v43 = vmul.f32 %v2548_v38, %v2548_v38 }
  0x9e   :  { %v151_v40 = vpop.permute.xlu0 %150  ;;  %v2571_v49 = vmul.f32 %v153_v39, %v2438_v34 }
  0x9f   :  { %v2560_v44 = vmul.f32 %v151_v40, %v2444_v36 }
  0xa0   :  { %v265_v56 = vmul.f32 %v2571_v49, %v2571_v49 }
  0xa1   :  { %300 = vrot.lane.b32.xlu1 %v259_v35, %s2289_s21  ;;  %302 = vrot.lane.b32.xlu0 %v260_v37, %s2289_s21  ;;  %v2564_v45 = vpop.permute.xlu1 %188  ;;  %v264_v50 = vmul.f32 %v2560_v44, %v2560_v44 }
  0xa2   :  { %v2566_v46 = vpop.permute.xlu0 %186 }
  0xa5   :  { %304 = vrot.lane.b32.xlu1 %v261_v41, %s2289_s21  ;;  %306 = vrot.lane.b32.xlu0 %v262_v43, %s2289_s21  ;;  %v365_v51 = vpop.permute.xlu1 %364 }
  0xa6   :  { %v411_v52 = vmul.f32 %v365_v51, %v2364_v6  ;;  %v363_v53 = vpop.permute.xlu0 %362 }
  0xa7   :  { %v410_v54 = vmul.f32 %v363_v53, %v2351_v1 }
  0xa8   :  { %v427_v55 = vmax.f32 %v411_v52, 1e-06 }
  0xa9   :  { %v426_v57 = vmax.f32 %v410_v54, 1e-06  ;;  %308 = vrot.lane.b32.xlu1 %v263_v47, %s2289_s21  ;;  %310 = vrot.lane.b32.xlu0 %v264_v50, %s2289_s21  ;;  %v2583_v58 = vpop.permute.xlu1 %192 }
  0xaa   :  { %2201 = vrcp.f32 %v427_v55  ;;  %v2585_v59 = vpop.permute.xlu0 %190 }
  0xab   :  { %2203 = vrcp.f32 %v426_v57 }
  0xad   :  { %312 = vrot.lane.b32.xlu1 %v265_v56, %s2289_s21  ;;  %530 = vrot.lane.b32.xlu0 %v2502_v60, %s2293_s12  ;;  %v369_v61 = vpop.permute.xlu1 %368 }
  0xae   :  { %v413_v62 = vmul.f32 %v369_v61, %v2356_v2  ;;  %v367_v63 = vpop.permute.xlu0 %366 }
  0xaf   :  { %v412_v3 = vmul.f32 %v367_v63, %v2346_v0 }
  0xb0   :  { %v429_v5 = vmax.f32 %v413_v62, 1e-06 }
  0xb1   :  { %v428_v10 = vmax.f32 %v412_v3, 1e-06  ;;  %532 = vrot.lane.b32.xlu1 %v2507_v4, %s2293_s12  ;;  %v2594_v11 = vpop.permute.xlu1 %196 }
  0xb2   :  { %2205 = vrcp.f32 %v429_v5  ;;  %v2596_v14 = vpop.permute.xlu0 %194 }
  0xb3   :  { %2207 = vrcp.f32 %v428_v10 }
  0xb4   :  { %v2202_v18 = vpop.eup %2201 }
  0xb5   :  { %v2204_v19 = vpop.eup %2203  ;;  %v373_v60 = vpop.permute.xlu1 %372  ;;  %652 = vrot.lane.b32.xlu1 %v2202_v18, %s2293_s12 }
  0xb6   :  { %v415_v21 = vmul.f32 %v373_v60, %v2370_v8  ;;  %v371_v23 = vpop.permute.xlu0 %370  ;;  %650 = vrot.lane.b32.xlu0 %v2204_v19, %s2293_s12 }
  0xb7   :  { %v414_v25 = vmul.f32 %v371_v23, %v2375_v9 }
  0xb8   :  { %v431_v27 = vmax.f32 %v415_v21, 1e-06 }
  0xb9   :  { %v430_v4 = vmax.f32 %v414_v25, 1e-06  ;;  %v2602_v31 = vpop.permute.xlu1 %200 }
  0xba   :  { %2209 = vrcp.f32 %v431_v27  ;;  %v2604_v32 = vpop.permute.xlu0 %198 }
  0xbb   :  { %2211 = vrcp.f32 %v430_v4 }
  0xbc   :  { %v2206_v35 = vpop.eup %2205 }
  0xbd   :  { %v2208_v37 = vpop.eup %2207  ;;  %v377_v39 = vpop.permute.xlu1 %376  ;;  %656 = vrot.lane.b32.xlu1 %v2206_v35, %s2293_s12 }
  0xbe   :  { %v417_v40 = vmul.f32 %v377_v39, %v2382_v12  ;;  %v375_v41 = vpop.permute.xlu0 %374  ;;  %654 = vrot.lane.b32.xlu0 %v2208_v37, %s2293_s12 }
  0xbf   :  { %v416_v43 = vmul.f32 %v375_v41, %v2387_v13 }
  0xc0   :  { %v433_v47 = vmax.f32 %v417_v40, 1e-06 }
  0xc1   :  { %v432_v50 = vmax.f32 %v416_v43, 1e-06  ;;  %v2610_v51 = vpop.permute.xlu1 %204 }
  0xc2   :  { %2213 = vrcp.f32 %v433_v47  ;;  %v2612_v52 = vpop.permute.xlu0 %202 }
  0xc3   :  { %2215 = vrcp.f32 %v432_v50  ;;  %v749_v50 = vld [vmem:[%s3291_s1] sm:$0xff] }
  0xc4   :  { %v2210_v53 = vpop.eup %2209 }
  0xc5   :  { %v2212_v54 = vpop.eup %2211  ;;  %v381_v55 = vpop.permute.xlu1 %380  ;;  %660 = vrot.lane.b32.xlu1 %v2210_v53, %s2293_s12 }
  0xc6   :  { %v419_v56 = vmul.f32 %v381_v55, %v2394_v16  ;;  %658 = vrot.lane.b32.xlu0 %v2212_v54, %s2293_s12  ;;  %v379_v57 = vpop.permute.xlu0 %378 }
  0xc7   :  { %v418_v61 = vmul.f32 %v379_v57, %v2399_v17 }
  0xc8   :  { %v435_v62 = vmax.f32 %v419_v56, 1e-06 }
  0xc9   :  { %v434_v63 = vmax.f32 %v418_v61, 1e-06  ;;  %v2618_v3 = vpop.permute.xlu1 %208  ;;  %536 = vrot.lane.b32.xlu1 %v2517_v15, %s2293_s12 }
  0xca   :  { %2217 = vrcp.f32 %v435_v62  ;;  %534 = vrot.lane.b32.xlu0 %v2512_v7, %s2293_s12  ;;  %v2624_v5 = vpop.permute.xlu0 %206 }
  0xcb   :  { %2219 = vrcp.f32 %v434_v63 }
  0xcc   :  { %v2214_v10 = vpop.eup %2213 }
  0xcd   :  { %v2216_v18 = vpop.eup %2215  ;;  %v385_v19 = vpop.permute.xlu1 %384  ;;  %664 = vrot.lane.b32.xlu1 %v2214_v10, %s2293_s12  ;;  %v236_v10 = vmul.f32 %v2585_v59, %v2346_v0  ;;  %v239_v0 = vmul.f32 %v2594_v11, %v2370_v8  ;;  %v240_v59 = vmul.f32 %v2604_v32, %v2387_v13  ;;  %v241_v8 = vmul.f32 %v2602_v31, %v2382_v12 }
  0xce   :  { %v421_v60 = vmul.f32 %v385_v19, %v2410_v22  ;;  %662 = vrot.lane.b32.xlu0 %v2216_v18, %s2293_s12  ;;  %v383_v21 = vpop.permute.xlu0 %382  ;;  %v242_v13 = vmul.f32 %v2612_v52, %v2399_v17  ;;  %v244_v12 = vmul.f32 %v2624_v5, %v2416_v24 }
  0xcf   :  { %v420_v23 = vmul.f32 %v383_v21, %v2416_v24 }
  0xd0   :  { %v437_v15 = vmax.f32 %v421_v60, 1e-06 }
  0xd1   :  { %v436_v25 = vmax.f32 %v420_v23, 1e-06  ;;  %540 = vrot.lane.b32.xlu1 %v2531_v26, %s2293_s12  ;;  %v2632_v7 = vpop.permute.xlu1 %212 }
  0xd2   :  { %2221 = vrcp.f32 %v437_v15  ;;  %538 = vrot.lane.b32.xlu0 %v2524_v20, %s2293_s12  ;;  %v2636_v27 = vpop.permute.xlu0 %210  ;;  %v237_v15 = vmul.f32 %v2583_v58, %v2356_v2 }
  0xd3   :  { %2223 = vrcp.f32 %v436_v25  ;;  %v246_v24 = vmul.f32 %v2636_v27, %v2430_v30 }
  0xd4   :  { %v2218_v4 = vpop.eup %2217 }
  0xd5   :  { %v2220_v35 = vpop.eup %2219  ;;  %668 = vrot.lane.b32.xlu1 %v2218_v4, %s2293_s12  ;;  %v389_v37 = vpop.permute.xlu1 %388 }
  0xd6   :  { %666 = vrot.lane.b32.xlu0 %v2220_v35, %s2293_s12  ;;  %v387_v39 = vpop.permute.xlu0 %386  ;;  %v423_v40 = vmul.f32 %v389_v37, %v2424_v28 }
  0xd7   :  { %v422_v26 = vmul.f32 %v387_v39, %v2430_v30 }
  0xd8   :  { %v439_v41 = vmax.f32 %v423_v40, 1e-06  ;;  %v2294_v40 = vmov 0.0|0.0  }
  0xd9   :  { %v438_v43 = vmax.f32 %v422_v26, 1e-06  ;;  %544 = vrot.lane.b32.xlu1 %v2541_v33, %s2293_s12  ;;  %v2663_v54 = vpop.permute.xlu1 %216  ;;  %1975 = vmatprep.subr.bf16.mxu1 %v2294_v40 }
  0xda   :  { %542 = vrot.lane.b32.xlu0 %v2536_v29, %s2293_s12  ;;  %v2659_v53 = vpop.permute.xlu0 %214  ;;  %2047 = vmatprep.subr.bf16.mxu0 %v2294_v40 }
  0xdb   :  { %2225 = vrcp.f32 %v438_v43  ;;  %v248_v30 = vmul.f32 %v2659_v53, %v2444_v36 }
  0xdc   :  { %v2222_v20 = vpop.eup %2221  ;;  %2227 = vrcp.f32 %v439_v41 }
  0xdd   :  { %v2224_v47 = vpop.eup %2223  ;;  %672 = vrot.lane.b32.xlu1 %v2222_v20, %s2293_s12  ;;  %v2667_v55 = vpop.permute.xlu1 %392 }
  0xde   :  { %670 = vrot.lane.b32.xlu0 %v2224_v47, %s2293_s12 }
  0xe1   :  { %546 = vrot.lane.b32.xlu1 %v2548_v38, %s2293_s12  ;;  %v2665_v38 = vpop.permute.xlu0 %390 }
  0xe2   :  { %755 = vperm.xlu0 %2160, %v749_v50  }
  0xe5   :  { %v2226_v33 = vpop.eup %2225  ;;  %548 = vrot.lane.b32.xlu1 %v2555_v42, %s2293_s12 }
  0xe6   :  { %v2228_v29 = vpop.eup %2227  ;;  %674 = vrot.lane.b32.xlu0 %v2226_v33, %s2293_s12  ;;  %v243_v33 = vmul.f32 %v2610_v51, %v2394_v16  ;;  %v245_v16 = vmul.f32 %v2618_v3, %v2410_v22  ;;  %v247_v22 = vmul.f32 %v2632_v7, %v2424_v28  ;;  %v249_v7 = vmul.f32 %v2663_v54, %v2438_v34 }
  0xe9   :  { %676 = vrot.lane.b32.xlu1 %v2228_v29, %s2293_s12 }
  0xea   :  { %550 = vrot.lane.b32.xlu0 %v2560_v44, %s2293_s12  ;;  %v234_v44 = vmul.f32 %v2566_v46, %v2351_v1  ;;  %v238_v1 = vmul.f32 %v2596_v14, %v2375_v9 }
  0xed   :  { %552 = vrot.lane.b32.xlu1 %v2571_v49, %s2293_s12  ;;  %v235_v49 = vmul.f32 %v2564_v45, %v2364_v6 }
  0xf7   :  { %v2669_v42 = vpop.permute.xlu0 %522 }
  0xfb   :  { %v2671_v56 = vpop.permute.xlu1 %524  ;;  %v2673_v57 = vpop.permute.xlu0 %526 }
  0xff   :  { %v2677_v61 = vpop.permute.xlu1 %528  ;;  %v283_v62 = vpop.permute.xlu0 %282 }
 0x100   :  { %v330_v63 = vsub.f32 %v234_v44, %v283_v62 }
 0x102   :  { %v346_v18 = vmax.f32 %v330_v63, 1e-06 }
 0x103   :  { %v285_v19 = vpop.permute.xlu1 %284  ;;  %v287_v60 = vpop.permute.xlu0 %286 }
 0x104   :  { %2229 = vrcp.f32 %v346_v18  ;;  %v331_v21 = vsub.f32 %v235_v49, %v285_v19  ;;  %v332_v23 = vsub.f32 %v236_v10, %v287_v60 }
 0x106   :  { %v347_v46 = vmax.f32 %v331_v21, 1e-06  ;;  %v348_v25 = vmax.f32 %v332_v23, 1e-06 }
 0x107   :  { %v289_v4 = vpop.permute.xlu1 %288  ;;  %v291_v35 = vpop.permute.xlu0 %290 }
 0x108   :  { %2231 = vrcp.f32 %v347_v46  ;;  %v333_v6 = vsub.f32 %v237_v15, %v289_v4  ;;  %v334_v45 = vsub.f32 %v238_v1, %v291_v35  ;;  %v424_v35 = vmul.f32 %v2665_v38, %v2444_v36 }
 0x109   :  { %2233 = vrcp.f32 %v348_v25 }
 0x10a   :  { %v349_v37 = vmax.f32 %v333_v6, 1e-06  ;;  %v350_v39 = vmax.f32 %v334_v45, 1e-06 }
 0x10b   :  { %v293_v2 = vpop.permute.xlu1 %292  ;;  %v295_v58 = vpop.permute.xlu0 %294 }
 0x10c   :  { %2235 = vrcp.f32 %v349_v37  ;;  %v335_v9 = vsub.f32 %v239_v0, %v293_v2  ;;  %v336_v14 = vsub.f32 %v240_v59, %v295_v58  ;;  %v425_v59 = vmul.f32 %v2667_v55, %v2438_v34 }
 0x10d   :  { %2237 = vrcp.f32 %v350_v39  ;;  %v440_v39 = vmax.f32 %v424_v35, 1e-06 }
 0x10e   :  { %v2230_v26 = vpop.eup %2229  ;;  %v351_v11 = vmax.f32 %v335_v9, 1e-06  ;;  %v352_v32 = vmax.f32 %v336_v14, 1e-06  ;;  %v441_v54 = vmax.f32 %v425_v59, 1e-06 }
 0x10f   :  { %v297_v41 = vpop.permute.xlu1 %296  ;;  %586 = vrot.lane.b32.xlu0 %v2230_v26, %s2293_s12  ;;  %v299_v43 = vpop.permute.xlu0 %298 }
 0x110   :  { %2239 = vrcp.f32 %v351_v11  ;;  %v337_v20 = vsub.f32 %v241_v8, %v297_v41  ;;  %v338_v47 = vsub.f32 %v242_v13, %v299_v43  ;;  %v2296_v8 = vmov 0.0   ;;  %v750_v13 = vld [vmem:[%s3291_s1 + $0x8] sm:$0xff] }
 0x111   :  { %2241 = vrcp.f32 %v352_v32  ;;  %1761 = vmatprep.mubr.msk.f32.mxu1 %vm2295_vm0, %v2296_v8  ;;  %1884 = vmatprep.mubr.msk.f32.mxu0 %vm2295_vm0, %v2296_v8  ;;  %v751_v32 = vld [vmem:[%s3291_s1 + $0x10] sm:$0xff] }
 0x112   :  { %v2232_v50 = vpop.eup %2231  ;;  %v353_v31 = vmax.f32 %v337_v20, 1e-06  ;;  %v354_v29 = vmax.f32 %v338_v47, 1e-06 }
 0x113   :  { %v2234_v17 = vpop.eup %2233  ;;  %v301_v52 = vpop.permute.xlu1 %300  ;;  %588 = vrot.lane.b32.xlu1 %v2232_v50, %s2293_s12 }
 0x114   :  { %v303_v44 = vpop.permute.xlu0 %302  ;;  %2243 = vrcp.f32 %v353_v31  ;;  %v339_v62 = vsub.f32 %v243_v33, %v301_v52  ;;  %590 = vrot.lane.b32.xlu0 %v2234_v17, %s2293_s12 }
 0x115   :  { %v340_v63 = vsub.f32 %v244_v12, %v303_v44  ;;  %2245 = vrcp.f32 %v354_v29 }
 0x116   :  { %v2236_v49 = vpop.eup %2235  ;;  %v355_v51 = vmax.f32 %v339_v62, 1e-06 }
 0x117   :  { %v356_v5 = vmax.f32 %v340_v63, 1e-06  ;;  %v2238_v10 = vpop.eup %2237  ;;  %v305_v18 = vpop.permute.xlu1 %304  ;;  %592 = vrot.lane.b32.xlu1 %v2236_v49, %s2293_s12 }
 0x118   :  { %v307_v19 = vpop.permute.xlu0 %306  ;;  %2247 = vrcp.f32 %v355_v51  ;;  %v341_v60 = vsub.f32 %v245_v16, %v305_v18  ;;  %594 = vrot.lane.b32.xlu0 %v2238_v10, %s2293_s12 }
 0x119   :  { %v342_v21 = vsub.f32 %v246_v24, %v307_v19  ;;  %2249 = vrcp.f32 %v356_v5 }
 0x11a   :  { %v2240_v23 = vpop.eup %2239  ;;  %v357_v3 = vmax.f32 %v341_v60, 1e-06 }
 0x11b   :  { %v358_v27 = vmax.f32 %v342_v21, 1e-06  ;;  %v2242_v15 = vpop.eup %2241  ;;  %v309_v1 = vpop.permute.xlu1 %308  ;;  %596 = vrot.lane.b32.xlu1 %v2240_v23, %s2293_s12 }
 0x11c   :  { %v311_v46 = vpop.permute.xlu0 %310  ;;  %2251 = vrcp.f32 %v357_v3  ;;  %v343_v25 = vsub.f32 %v247_v22, %v309_v1  ;;  %598 = vrot.lane.b32.xlu0 %v2242_v15, %s2293_s12 }
 0x11d   :  { %v344_v4 = vsub.f32 %v248_v30, %v311_v46  ;;  %2253 = vrcp.f32 %v358_v27 }
 0x11e   :  { %v2244_v28 = vpop.eup %2243  ;;  %v359_v53 = vmax.f32 %v343_v25, 1e-06 }
 0x11f   :  { %v360_v6 = vmax.f32 %v344_v4, 1e-06  ;;  %v2246_v45 = vpop.eup %2245  ;;  %v313_v0 = vpop.permute.xlu1 %312  ;;  %600 = vrot.lane.b32.xlu1 %v2244_v28, %s2293_s12 }
 0x120   :  { %2255 = vrcp.f32 %v359_v53  ;;  %v345_v37 = vsub.f32 %v249_v7, %v313_v0  ;;  %602 = vrot.lane.b32.xlu0 %v2246_v45, %s2293_s12  ;;  %v531_v43 = vpop.permute.xlu0 %530 }
 0x121   :  { %2257 = vrcp.f32 %v360_v6 }
 0x122   :  { %v2248_v36 = vpop.eup %2247  ;;  %v361_v38 = vmax.f32 %v345_v37, 1e-06 }
 0x123   :  { %v2250_v2 = vpop.eup %2249  ;;  %604 = vrot.lane.b32.xlu1 %v2248_v36, %s2293_s12  ;;  %v533_v41 = vpop.permute.xlu1 %532 }
 0x124   :  { %2259 = vrcp.f32 %v361_v38  ;;  %606 = vrot.lane.b32.xlu0 %v2250_v2, %s2293_s12 }
 0x125   :  { %2261 = vrcp.f32 %v440_v39 }
 0x126   :  { %v2252_v58 = vpop.eup %2251  ;;  %2263 = vrcp.f32 %v441_v54 }
 0x127   :  { %v2254_v9 = vpop.eup %2253  ;;  %608 = vrot.lane.b32.xlu1 %v2252_v58, %s2293_s12  ;;  %v653_v20 = vpop.permute.xlu1 %652 }
 0x128   :  { %610 = vrot.lane.b32.xlu0 %v2254_v9, %s2293_s12  ;;  %v651_v47 = vpop.permute.xlu0 %650 }
 0x12a   :  { %v2256_v34 = vpop.eup %2255 }
 0x12b   :  { %v2258_v55 = vpop.eup %2257  ;;  %612 = vrot.lane.b32.xlu1 %v2256_v34, %s2293_s12 }
 0x12c   :  { %614 = vrot.lane.b32.xlu0 %v2258_v55, %s2293_s12 }
 0x12e   :  { %v2260_v14 = vpop.eup %2259 }
 0x12f   :  { %v2262_v26 = vpop.eup %2261  ;;  %616 = vrot.lane.b32.xlu1 %v2260_v14, %s2293_s12  ;;  %v657_v50 = vpop.permute.xlu1 %656 }
 0x130   :  { %678 = vrot.lane.b32.xlu0 %v2262_v26, %s2293_s12  ;;  %v2264_v11 = vpop.eup %2263  ;;  %v655_v33 = vpop.permute.xlu0 %654 }
 0x133   :  { %680 = vrot.lane.b32.xlu1 %v2264_v11, %s2293_s12 }
 0x134   :  { %758 = vperm.xlu0 %2160, %v750_v13  }
 0x137   :  { %761 = vperm.xlu1 %2161, %v751_v32   ;;  %v661_v12 = vpop.permute.xlu1 %660 }
 0x138   :  { %v659_v31 = vpop.permute.xlu0 %658 }
 0x13b   :  { %v2743_v29 = vpop.permute.xlu1 %536 }
 0x13c   :  { %v535_v17 = vpop.permute.xlu0 %534 }
 0x13f   :  { %v2745_v52 = vpop.permute.xlu1 %664 }
 0x140   :  { %v663_v44 = vpop.permute.xlu0 %662 }
 0x143   :  { %v2747_v62 = vpop.permute.xlu1 %540 }
 0x144   :  { %v2749_v63 = vpop.permute.xlu0 %538 }
 0x147   :  { %v2751_v49 = vpop.permute.xlu1 %668 }
 0x148   :  { %v2753_v16 = vpop.permute.xlu0 %666 }
 0x14b   :  { %v2755_v24 = vpop.permute.xlu1 %544 }
 0x14c   :  { %v2757_v51 = vpop.permute.xlu0 %542 }
 0x14f   :  { %v2759_v5 = vpop.permute.xlu1 %672 }
 0x150   :  { %v2761_v10 = vpop.permute.xlu0 %670 }
 0x153   :  { %v2763_v18 = vpop.permute.xlu1 %546 }
 0x157   :  { %v2767_v60 = vpop.permute.xlu1 %548 }
 0x15b   :  { %v2771_v23 = vpop.permute.xlu1 %676 }
 0x15f   :  { %v2775_v30 = vpop.permute.xlu1 %552 }
 0x161   :  { %v2765_v19 = vpop.permute.xlu0 %755 }
 0x165   :  { %v2769_v21 = vpop.permute.xlu0 %674 }
 0x169   :  { %v2773_v22 = vpop.permute.xlu0 %550 }
 0x181   :  { %v587_v3 = vpop.permute.xlu0 %586 }
 0x182   :  { %v699_v27 = vsel %vm698_vm1, %v2669_v42, %v587_v3 }
 0x183   :  { %v716_v15 = vsel %vm715_vm2, %v699_v27, %v651_v47 }
 0x184   :  { %v2781_v46 = vsel %vm732_vm3, %v716_v15, 0.0 }
 0x185   :  { %v589_v1 = vpop.permute.xlu1 %588  ;;  %v773_v53 = vand.u32 4294901760, %v2781_v46 }
 0x186   :  { %v700_v25 = vsel %vm698_vm1, %v2671_v56, %v589_v1  ;;  %v591_v4 = vpop.permute.xlu0 %590 }
 0x187   :  { %v717_v35 = vsel %vm715_vm2, %v700_v25, %v653_v20  ;;  %v701_v28 = vsel %vm698_vm1, %v2673_v57, %v591_v4 }
 0x188   :  { %v2789_v7 = vsel %vm732_vm3, %v717_v35, 0.0  ;;  %v718_v42 = vsel %vm715_vm2, %v701_v28, %v655_v33  ;;  %v752_v33 = vlaneseq }
 0x189   :  { %v776_v6 = vand.u32 4294901760, %v2789_v7  ;;  %v593_v45 = vpop.permute.xlu1 %592  ;;  %v2795_v0 = vsel %vm732_vm3, %v718_v42, 0.0 }
 0x18a   :  { %v702_v56 = vsel %vm698_vm1, %v2677_v61, %v593_v45  ;;  %v595_v59 = vpop.permute.xlu0 %594  ;;  %v779_v2 = vand.u32 4294901760, %v2795_v0 }
 0x18b   :  { %v719_v37 = vsel %vm715_vm2, %v702_v56, %v657_v50  ;;  %v703_v57 = vsel %vm698_vm1, %v531_v43, %v595_v59  ;;  %v2805_v39 = vpack.c.bf16 %v776_v6, %v773_v53 }
 0x18c   :  { %v2808_v36 = vsel %vm732_vm3, %v719_v37, 0.0  ;;  %v720_v38 = vsel %vm715_vm2, %v703_v57, %v659_v31 }
 0x18d   :  { %v782_v61 = vand.u32 4294901760, %v2808_v36  ;;  %v597_v54 = vpop.permute.xlu1 %596  ;;  %1977 = vmatpush3.bf16.msra.mxu1 %v2805_v39  ;;  %2049 = vmatpush3.bf16.msra.mxu0 %v2805_v39  ;;  %v2816_v58 = vsel %vm732_vm3, %v720_v38, 0.0 }
 0x18e   :  { %v704_v9 = vsel %vm698_vm1, %v533_v41, %v597_v54  ;;  %v599_v34 = vpop.permute.xlu0 %598  ;;  %1978 = vmatprep.subr.bf16.mxu1 %v2294_v40  ;;  %2050 = vmatprep.subr.bf16.mxu0 %v2294_v40  ;;  %v785_v32 = vand.u32 4294901760, %v2816_v58 }
 0x18f   :  { %v721_v55 = vsel %vm715_vm2, %v704_v9, %v661_v12  ;;  %v705_v14 = vsel %vm698_vm1, %v535_v17, %v599_v34  ;;  %v2827_v26 = vpack.c.bf16 %v782_v61, %v779_v2  ;;  %v2926_v34 = vsub.f32 %v2789_v7, %v776_v6 }
 0x190   :  { %v2830_v13 = vsel %vm732_vm3, %v721_v55, 0.0  ;;  %v722_v11 = vsel %vm715_vm2, %v705_v14, %v663_v44 }
 0x191   :  { %v788_v41 = vand.u32 4294901760, %v2830_v13  ;;  %v601_v43 = vpop.permute.xlu1 %600  ;;  %1980 = vmatpush3.bf16.msra.mxu1 %v2827_v26  ;;  %2052 = vmatpush3.bf16.msra.mxu0 %v2827_v26  ;;  %v2838_v20 = vsel %vm732_vm3, %v722_v11, 0.0  ;;  %v2938_v11 = vsub.f32 %v2781_v46, %v773_v53  ;;  %v2961_v53 = vsub.f32 %v2808_v36, %v782_v61 }
 0x192   :  { %v706_v47 = vsel %vm698_vm1, %v2743_v29, %v601_v43  ;;  %v603_v50 = vpop.permute.xlu0 %602  ;;  %1981 = vmatprep.subr.bf16.mxu1 %v2294_v40  ;;  %2053 = vmatprep.subr.bf16.mxu0 %v2294_v40  ;;  %v791_v3 = vand.u32 4294901760, %v2838_v20  ;;  %v2978_v36 = vsub.f32 %v2795_v0, %v779_v2 }
 0x193   :  { %v723_v12 = vsel %vm715_vm2, %v706_v47, %v2745_v52  ;;  %v707_v31 = vsel %vm698_vm1, %v2749_v63, %v603_v50  ;;  %v2852_v17 = vpack.c.bf16 %v788_v41, %v785_v32  ;;  %v2992_v0 = vsub.f32 %v2830_v13, %v788_v41 }
 0x194   :  { %v2855_v29 = vsel %vm732_vm3, %v723_v12, 0.0  ;;  %v724_v44 = vsel %vm715_vm2, %v707_v31, %v2753_v16  ;;  %v2870_v16 = vand.u32 127, %v752_v33  ;;  %v886_v31 = vand.u32 4294901760, %v2938_v11 }
 0x195   :  { %v794_v27 = vand.u32 4294901760, %v2855_v29  ;;  %v605_v52 = vpop.permute.xlu1 %604  ;;  %1983 = vmatpush3.bf16.msra.mxu1 %v2852_v17  ;;  %2055 = vmatpush3.bf16.msra.mxu0 %v2852_v17  ;;  %v2864_v63 = vsel %vm732_vm3, %v724_v44, 0.0  ;;  %v3006_v13 = vsub.f32 %v2816_v58, %v785_v32 }
 0x196   :  { %v708_v15 = vsel %vm698_vm1, %v2747_v62, %v605_v52  ;;  %v607_v1 = vpop.permute.xlu0 %606  ;;  %1984 = vmatprep.subr.bf16.mxu1 %v2294_v40  ;;  %2056 = vmatprep.subr.bf16.mxu0 %v2294_v40  ;;  %v797_v42 = vand.u32 4294901760, %v2864_v63  ;;  %vm763_vm4 = vcmp.eq.s32.totalorder %v2870_v16, %v2765_v19 }
 0x197   :  { %v725_v25 = vsel %vm715_vm2, %v708_v15, %v2751_v49  ;;  %v709_v4 = vsel %vm698_vm1, %v2757_v51, %v607_v1  ;;  %v2880_v35 = vpack.c.bf16 %v794_v27, %v791_v3 }
 0x198   :  { %v2883_v62 = vsel %vm732_vm3, %v725_v25, 0.0  ;;  %v726_v28 = vsel %vm715_vm2, %v709_v4, %v2761_v10  ;;  %v907_v25 = vand.u32 4294901760, %v2961_v53 }
 0x199   :  { %v800_v45 = vand.u32 4294901760, %v2883_v62  ;;  %v609_v49 = vpop.permute.xlu1 %608  ;;  %1986 = vmatpush3.bf16.msra.mxu1 %v2880_v35  ;;  %2058 = vmatpush3.bf16.msra.mxu0 %v2880_v35  ;;  %v2892_v51 = vsel %vm732_vm3, %v726_v28, 0.0  ;;  %v887_v28 = vsub.f32 %v2938_v11, %v886_v31 }
 0x19a   :  { %v710_v56 = vsel %vm698_vm1, %v2755_v24, %v609_v49  ;;  %v611_v59 = vpop.permute.xlu0 %610  ;;  %1987 = vmatprep.subr.bf16.mxu1 %v2294_v40  ;;  %2059 = vmatprep.subr.bf16.mxu0 %v2294_v40  ;;  %v803_v54 = vand.u32 4294901760, %v2892_v51  ;;  %v900_v49 = vand.u32 4294901760, %v2978_v36  ;;  %v908_v32 = vsub.f32 %v2961_v53, %v907_v25 }
 0x19b   :  { %v727_v10 = vsel %vm715_vm2, %v710_v56, %v2759_v5  ;;  %v711_v37 = vsel %vm698_vm1, %v2763_v18, %v611_v59  ;;  %v2908_v57 = vpack.c.bf16 %v800_v45, %v797_v42  ;;  %v1601_v18 = vsel %vm763_vm4, 1.0, %v2296_v8 }
 0x19c   :  { %v2911_v24 = vsel %vm732_vm3, %v727_v10, 0.0  ;;  %v728_v38 = vsel %vm715_vm2, %v711_v37, %v2769_v21  ;;  %v2951_v43 = vsub.f32 %v1601_v18, %v1601_v18  ;;  %v3013_v59 = vsub.f32 %v2855_v29, %v794_v27 }
 0x19d   :  { %v806_v9 = vand.u32 4294901760, %v2911_v24  ;;  %v613_v5 = vpop.permute.xlu1 %612  ;;  %1989 = vmatpush3.bf16.msra.mxu1 %v2908_v57  ;;  %2061 = vmatpush3.bf16.msra.mxu0 %v2908_v57  ;;  %v2929_v21 = vsel %vm732_vm3, %v728_v38, 0.0  ;;  %v921_v37 = vand.u32 4294901760, %v2992_v0  ;;  %v914_v29 = vand.u32 4294901760, %v3006_v13 }
 0x19e   :  { %v712_v55 = vsel %vm698_vm1, %v2767_v60, %v613_v5  ;;  %v615_v14 = vpop.permute.xlu0 %614  ;;  %1990 = vmatprep.subr.bf16.mxu1 %v2294_v40  ;;  %2062 = vmatprep.subr.bf16.mxu0 %v2294_v40  ;;  %v809_v47 = vand.u32 4294901760, %v2929_v21  ;;  %v855_v1 = vand.u32 4294901760, %v2951_v43  ;;  %v3027_v5 = vsub.f32 %v2838_v20, %v791_v3 }
 0x19f   :  { %v729_v7 = vsel %vm715_vm2, %v712_v55, %v2771_v23  ;;  %v2946_v6 = vpack.c.bf16 %v806_v9, %v803_v54  ;;  %v893_v23 = vand.u32 4294901760, %v2926_v34  ;;  %v713_v33 = vsel %vm698_vm1, %v2773_v22, %v615_v14 }
 0x1a0   :  { %v2949_v60 = vsel %vm732_vm3, %v729_v7, 0.0  ;;  %v856_v10 = vsub.f32 %v2951_v43, %v855_v1  ;;  %v888_v27 = vand.u32 4294901760, %v887_v28  ;;  %v901_v18 = vsub.f32 %v2978_v36, %v900_v49 }
 0x1a1   :  { %v812_v50 = vand.u32 4294901760, %v2949_v60  ;;  %v617_v46 = vpop.permute.xlu1 %616  ;;  %1992 = vmatpush3.bf16.msra.mxu1 %v2946_v6  ;;  %2064 = vmatpush3.bf16.msra.mxu0 %v2946_v6  ;;  %v935_v55 = vand.u32 4294901760, %v3013_v59  ;;  %v2072_v7 = vpack.c.bf16 %v893_v23, %v886_v31  ;;  %v3039_v20 = vsub.f32 %v2883_v62, %v800_v45 }
 0x1a2   :  { %v679_v12 = vpop.permute.xlu0 %678  ;;  %1993 = vmatprep.subr.bf16.mxu1 %v2294_v40  ;;  %2065 = vmatprep.subr.bf16.mxu0 %v2294_v40  ;;  %v714_v22 = vsel %vm698_vm1, %v2775_v30, %v617_v46  ;;  %v894_v30 = vsub.f32 %v2926_v34, %v893_v23  ;;  %v857_v14 = vand.u32 4294901760, %v856_v10  ;;  %v909_v46 = vand.u32 4294901760, %v908_v32 }
 0x1a3   :  { %v730_v44 = vsel %vm715_vm2, %v713_v33, %v679_v12  ;;  %v2973_v52 = vpack.c.bf16 %v812_v50, %v809_v47  ;;  %v922_v33 = vsub.f32 %v2992_v0, %v921_v37  ;;  %v928_v12 = vand.u32 4294901760, %v3027_v5 }
 0x1a4   :  { %v2983_v61 = vsel %vm732_vm3, %v730_v44, 0.0  ;;  %v895_v58 = vand.u32 4294901760, %v894_v30  ;;  %v3046_v44 = vsub.f32 %v2864_v63, %v797_v42  ;;  %v902_v23 = vand.u32 4294901760, %v901_v18 }
 0x1a5   :  { %v681_v15 = vpop.permute.xlu1 %680  ;;  %1995 = vmatpush3.bf16.msra.mxu1 %v2973_v52  ;;  %2067 = vmatpush3.bf16.msra.mxu0 %v2973_v52  ;;  %v815_v41 = vand.u32 4294901760, %v2983_v61  ;;  %v915_v31 = vsub.f32 %v3006_v13, %v914_v29  ;;  %v3052_v62 = vsub.f32 %v2911_v24, %v806_v9  ;;  %v936_v45 = vsub.f32 %v3013_v59, %v935_v55 }
 0x1a6   :  { %v731_v2 = vsel %vm715_vm2, %v714_v22, %v681_v15  ;;  %1996 = vmatprep.subr.bf16.mxu1 %v2294_v40  ;;  %2068 = vmatprep.subr.bf16.mxu0 %v2294_v40  ;;  %v2000_v3 = vpack.c.bf16 %v895_v58, %v888_v27  ;;  %v949_v22 = vand.u32 4294901760, %v3039_v20  ;;  %v2003_v63 = vpack.c.bf16 %v909_v46, %v902_v23 }
 0x1a7   :  { %v2999_v4 = vsel %vm732_vm3, %v731_v2, 0.0  ;;  %v2075_v42 = vpack.c.bf16 %v907_v25, %v900_v49  ;;  %v923_v15 = vand.u32 4294901760, %v922_v33  ;;  %v929_v24 = vsub.f32 %v3027_v5, %v928_v12 }
 0x1a8   :  { %v818_v56 = vand.u32 4294901760, %v2999_v4  ;;  %v942_v9 = vand.u32 4294901760, %v3046_v44  ;;  %v3069_v2 = vsub.f32 %v2892_v51, %v803_v54  ;;  %v916_v25 = vand.u32 4294901760, %v915_v31 }
 0x1a9   :  { %v963_v30 = vand.u32 4294901760, %v3052_v62  ;;  %v3077_v28 = vsub.f32 %v2949_v60, %v812_v50  ;;  %v937_v51 = vand.u32 4294901760, %v936_v45  ;;  %v2078_v58 = vpack.c.bf16 %v921_v37, %v914_v29 }
 0x1aa   :  { %v3021_v38 = vpack.c.bf16 %v818_v56, %v815_v41  ;;  %v2006_v10 = vpack.c.bf16 %v923_v15, %v916_v25  ;;  %v950_v27 = vsub.f32 %v3039_v20, %v949_v22  ;;  %v3093_v60 = vsub.f32 %v2929_v21, %v809_v47 }
 0x1ab   :  { %v930_v50 = vand.u32 4294901760, %v929_v24  ;;  %v956_v18 = vand.u32 4294901760, %v3069_v2  ;;  %v943_v29 = vsub.f32 %v3046_v44, %v942_v9  ;;  %v977_v21 = vand.u32 4294901760, %v3077_v28 }
 0x1ac   :  { %1998 = vmatpush3.bf16.msra.mxu1 %v3021_v38  ;;  %2070 = vmatpush3.bf16.msra.mxu0 %v3021_v38  ;;  %v3112_v46 = vsub.f32 %v2999_v4, %v818_v56  ;;  %v951_v23 = vand.u32 4294901760, %v950_v27  ;;  %v964_v31 = vsub.f32 %v3052_v62, %v963_v30  ;;  %v970_v45 = vand.u32 4294901760, %v3093_v60 }
 0x1ad   :  { %1999 = vmatprep.subr.bf16.mxu1 %v2294_v40  ;;  %2071 = vmatprep.subr.bf16.mxu0 %v2294_v40  ;;  %v2009_v47 = vpack.c.bf16 %v937_v51, %v930_v50  ;;  %v944_v56 = vand.u32 4294901760, %v943_v29  ;;  %v2087_v27 = vpack.c.bf16 %v963_v30, %v956_v18 }
 0x1ae   :  { %v991_v24 = vand.u32 4294901760, %v3112_v46 }
 0x1af   :  { %1762 = vmatmul.mubr.f32.vlgmr.msra.gmra.mrb[0].mxu1 %v857_v14  ;;  %1885 = vmatmul.mubr.f32.vlgmr.msra.gmra.mrb[0].mxu0 %v855_v1  ;;  %v2012_v25 = vpack.c.bf16 %v951_v23, %v944_v56  ;;  %v2024_v23 = vpack.c.bf16 %v2926_v34, %v2938_v11  ;;  %v2027_v34 = vpack.c.bf16 %v2961_v53, %v2978_v36  ;;  %v1501_v56 = vld [vmem:[%s3292_s2 + $0x10] sm:$0xff] }
 0x1b0   :  { %2001 = vmatpush3.bf16.msra.mxu1 %v2000_v3  ;;  %2073 = vmatpush3.bf16.msra.mxu0 %v2072_v7  ;;  %v2081_v7 = vpack.c.bf16 %v935_v55, %v928_v12  ;;  %v3123_v12 = vsub.f32 %v2983_v61, %v815_v41  ;;  %v978_v61 = vsub.f32 %v3077_v28, %v977_v21 }
 0x1b1   :  { %2002 = vmatprep.subr.bf16.mxu1 %v2294_v40  ;;  %2074 = vmatprep.subr.bf16.mxu0 %v2294_v40  ;;  %v2039_v11 = vpack.c.bf16 %v3052_v62, %v3069_v2  ;;  %v2299_v62 = vmov 2  }
 0x1b2   :  { %1887 = vmatprep.mubr.msk.f32.mxu0 %vm2295_vm0, %v2296_v8  ;;  %1764 = vmatprep.mubr.msk.f32.mxu1 %vm2295_vm0, %v2296_v8  ;;  %v984_v51 = vand.u32 4294901760, %v3123_v12  ;;  %v979_v50 = vand.u32 4294901760, %v978_v61  ;;  %v1502_v61 = vld [vmem:[%s3293_s3] sm:$0xff] }
 0x1b3   :  { %v3062_v1 = vpop.permute.xlu0 %758 }
 0x1b4   :  { %vm764_vm5 = vcmp.eq.s32.totalorder %v2870_v16, %v3062_v1  ;;  %2004 = vmatpush3.bf16.msra.mxu1 %v2003_v63  ;;  %2076 = vmatpush3.bf16.msra.mxu0 %v2075_v42  ;;  %v957_v63 = vsub.f32 %v3069_v2, %v956_v18  ;;  %v2084_v42 = vpack.c.bf16 %v949_v22, %v942_v9  ;;  %v1499_v1 = vld [vmem:[%s3292_s2] sm:$0xff] }
 0x1b5   :  { %v1602_v49 = vsel %vm764_vm5, 1.0, %v2296_v8  ;;  %2005 = vmatprep.subr.bf16.mxu1 %v2294_v40  ;;  %2077 = vmatprep.subr.bf16.mxu0 %v2294_v40  ;;  %v971_v9 = vsub.f32 %v3093_v60, %v970_v45  ;;  %v2093_v18 = vpack.c.bf16 %v991_v24, %v984_v51 }
 0x1b6   :  { %v3085_v54 = vsub.f32 %v1602_v49, %v1602_v49  ;;  %v3087_v32 = vpop.permute.xlu1 %761  ;;  %v965_v49 = vand.u32 4294901760, %v964_v31  ;;  %v958_v22 = vand.u32 4294901760, %v957_v63  ;;  %v2297_v31 = vmov 1.0  }
 0x1b7   :  { %vm765_vm6 = vcmp.eq.s32.totalorder %v2870_v16, %v3087_v32 }
 0x1b8   :  { %2007 = vmatpush3.bf16.msra.mxu1 %v2006_v10  ;;  %2079 = vmatpush3.bf16.msra.mxu0 %v2078_v58  ;;  %v865_v14 = vand.u32 4294901760, %v3085_v54  ;;  %v1603_v37 = vsel %vm765_vm6, 1.0, %v2296_v8  ;;  %v992_v10 = vsub.f32 %v3112_v46, %v991_v24  ;;  %v2015_v58 = vpack.c.bf16 %v965_v49, %v958_v22 }
 0x1b9   :  { %2008 = vmatprep.subr.bf16.mxu1 %v2294_v40  ;;  %2080 = vmatprep.subr.bf16.mxu0 %v2294_v40  ;;  %v3107_v3 = vsub.f32 %v1603_v37, %v1603_v37  ;;  %v972_v37 = vand.u32 4294901760, %v971_v9 }
 0x1ba   :  { %1888 = vmatmul.mubr.f32.gmra.mrb[2].mxu0 %v865_v14  ;;  %v866_v33 = vsub.f32 %v3085_v54, %v865_v14  ;;  %v985_v14 = vsub.f32 %v3123_v12, %v984_v51  ;;  %v993_v29 = vand.u32 4294901760, %v992_v10 }
 0x1bb   :  { %1890 = vmatprep.mubr.msk.f32.mxu0 %vm2295_vm0, %v2296_v8  ;;  %v875_v55 = vand.u32 4294901760, %v3107_v3 }
 0x1bc   :  { %2010 = vmatpush3.bf16.msra.mxu1 %v2009_v47  ;;  %2082 = vmatpush3.bf16.msra.mxu0 %v2081_v7  ;;  %v867_v4 = vand.u32 4294901760, %v866_v33  ;;  %v2018_v47 = vpack.c.bf16 %v979_v50, %v972_v37  ;;  %v2090_v7 = vpack.c.bf16 %v977_v21, %v970_v45  ;;  %v986_v33 = vand.u32 4294901760, %v985_v14  ;;  %v1614_v21 = vld [vmem:[%s3295_s5] ss:$0 sm:$0xff]  ;;  %v1504_v50 = vld [vmem:[%s3293_s3 + $0x10] sm:$0xff] }
 0x1bd   :  { %2011 = vmatprep.subr.bf16.mxu1 %v2294_v40  ;;  %2083 = vmatprep.subr.bf16.mxu0 %v2294_v40  ;;  %v876_v15 = vsub.f32 %v3107_v3, %v875_v55 }
 0x1be   :  { %1765 = vmatmul.mubr.f32.gmra.mrb[2].mxu1 %v867_v4  ;;  %1891 = vmatmul.mubr.f32.gmra.mrb[4].mxu0 %v875_v55  ;;  %v2021_v30 = vpack.c.bf16 %v993_v29, %v986_v33 }
 0x1bf   :  { %1767 = vmatprep.mubr.msk.f32.mxu1 %vm2295_vm0, %v2296_v8  ;;  %v877_v41 = vand.u32 4294901760, %v876_v15  ;;  %1925 = vmatprep.mubr.msk.f32.mxu0 %vm2295_vm0, %v2296_v8 }
 0x1c0   :  { %2013 = vmatpush3.bf16.msra.mxu1 %v2012_v25  ;;  %2085 = vmatpush3.bf16.msra.mxu0 %v2084_v42 }
 0x1c1   :  { %2014 = vmatprep.subr.bf16.mxu1 %v2294_v40  ;;  %2086 = vmatprep.subr.bf16.mxu0 %v2294_v40 }
 0x1c2   :  { %1768 = vmatmul.mubr.f32.gmra.mrb[4].mxu1 %v877_v41  ;;  %v1503_v41 = vld [vmem:[%s3293_s3 + $0x8] sm:$0xff] }
 0x1c3   :  { %1802 = vmatprep.mubr.msk.f32.mxu1 %vm2295_vm0, %v2296_v8 }
 0x1c4   :  { %2016 = vmatpush3.bf16.msra.mxu1 %v2015_v58  ;;  %2088 = vmatpush3.bf16.msra.mxu0 %v2087_v27 }
 0x1c5   :  { %2017 = vmatprep.subr.bf16.mxu1 %v2294_v40  ;;  %2089 = vmatprep.subr.bf16.mxu0 %v2294_v40 }
 0x1c8   :  { %2019 = vmatpush3.bf16.msra.mxu1 %v2018_v47  ;;  %2091 = vmatpush3.bf16.msra.mxu0 %v2090_v7 }
 0x1c9   :  { %2020 = vmatprep.subr.bf16.mxu1 %v2294_v40  ;;  %2092 = vmatprep.subr.bf16.mxu0 %v2294_v40 }
 0x1cc   :  { %2022 = vmatpush3.bf16.msra.mxu1 %v2021_v30  ;;  %2094 = vmatpush3.bf16.msra.mxu0 %v2093_v18 }
 0x1cd   :  { %2023 = vmatprep.subr.bf16.mxu1 %v2294_v40  ;;  %2095 = vmatprep.subr.bf16.mxu0 %v2294_v40 }
 0x1cf   :  { %1803 = vmatmul.mubr.msk.f32.vlgmr.msra.gmra.mrb[0].mxu1 %vm763_vm4, %v2297_v31  ;;  %1926 = vmatmul.mubr.msk.f32.vlgmr.msra.gmra.mrb[0].mxu0 %vm763_vm4, %v2297_v31 }
 0x1d0   :  { %2025 = vmatpush3.bf16.msra.mxu1 %v2024_v23  ;;  %2097 = vmatpush3.bf16.msra.mxu0 %v2805_v39  ;;  %v2030_v39 = vpack.c.bf16 %v2992_v0, %v3006_v13 }
 0x1d1   :  { %1805 = vmatprep.mubr.msk.f32.mxu1 %vm2295_vm0, %v2296_v8  ;;  %1928 = vmatprep.mubr.msk.f32.mxu0 %vm2295_vm0, %v2296_v8 }
 0x1d2   :  { %2026 = vmatprep.subr.bf16.mxu1 %v2294_v40  ;;  %2098 = vmatprep.subr.bf16.mxu0 %v2294_v40 }
 0x1d3   :  { %1806 = vmatmul.mubr.msk.f32.gmra.mrb[2].mxu1 %vm764_vm5, %v2297_v31  ;;  %1929 = vmatmul.mubr.msk.f32.gmra.mrb[2].mxu0 %vm764_vm5, %v2297_v31 }
 0x1d4   :  { %2028 = vmatpush3.bf16.msra.mxu1 %v2027_v34  ;;  %2100 = vmatpush3.bf16.msra.mxu0 %v2827_v26  ;;  %v2033_v26 = vpack.c.bf16 %v3013_v59, %v3027_v5 }
 0x1d5   :  { %1808 = vmatprep.mubr.msk.f32.mxu1 %vm2295_vm0, %v2296_v8  ;;  %1931 = vmatprep.mubr.msk.f32.mxu0 %vm2295_vm0, %v2296_v8 }
 0x1d6   :  { %2029 = vmatprep.subr.bf16.mxu1 %v2294_v40  ;;  %2101 = vmatprep.subr.bf16.mxu0 %v2294_v40 }
 0x1d7   :  { %1809 = vmatmul.mubr.msk.f32.gmra.mrb[4].mxu1 %vm765_vm6, %v2297_v31  ;;  %1932 = vmatmul.mubr.msk.f32.gmra.mrb[4].mxu0 %vm765_vm6, %v2297_v31 }
 0x1d8   :  { %2031 = vmatpush3.bf16.msra.mxu1 %v2030_v39  ;;  %2103 = vmatpush3.bf16.msra.mxu0 %v2852_v17  ;;  %v2036_v17 = vpack.c.bf16 %v3039_v20, %v3046_v44 }
 0x1d9   :  { %2032 = vmatprep.subr.bf16.mxu1 %v2294_v40  ;;  %2104 = vmatprep.subr.bf16.mxu0 %v2294_v40 }
 0x1da   :  { %1843 = vmatprep.mubr.msk.f32.mxu1 %vm2295_vm0, %v2296_v8  ;;  %1966 = vmatprep.mubr.msk.f32.mxu0 %vm2295_vm0, %v2296_v8 }
 0x1dc   :  { %2034 = vmatpush3.bf16.msra.mxu1 %v2033_v26  ;;  %2106 = vmatpush3.bf16.msra.mxu0 %v2880_v35  ;;  %v2042_v35 = vpack.c.bf16 %v3077_v28, %v3093_v60  ;;  %v1500_v60 = vld [vmem:[%s3292_s2 + $0x8] sm:$0xff]  ;;  %s1586_s2 = sshll.u32 %s2300_s30, 4  ;;  %s1587_s2 = int_to_ptr.vmem [resolvable:$true] %s1586_s2 }
 0x1dd   :  { %2035 = vmatprep.subr.bf16.mxu1 %v2294_v40  ;;  %2107 = vmatprep.subr.bf16.mxu0 %v2294_v40  ;;  %s2265_s13 = scalar_lea.vmem %s1587_s2, 384  ;;  %p2270_p1 = scmp.lt.s32.totalorder %s1587_s2, %s1587_s2 }
 0x1de   :  { %p2266_p0 = scmp.ne.s32.totalorder %s1587_s2, %s2265_s13  ;;  %p2271_p2 = scmp.lt.s32.totalorder %s2265_s13, %s2265_s13 }
 0x1e0   :  { %2037 = vmatpush3.bf16.msra.mxu1 %v2036_v17  ;;  %2109 = vmatpush3.bf16.msra.mxu0 %v2908_v57  ;;  %v2045_v57 = vpack.c.bf16 %v3112_v46, %v3123_v12  ;;  %p2272_p3 = por %p2271_p2, %p2270_p1 }
 0x1e1   :  { %2038 = vmatprep.subr.bf16.mxu1 %v2294_v40  ;;  %2110 = vmatprep.subr.bf16.mxu0 %v2294_v40 }
 0x1e2   :  { %p2273_p4 = pnand %p2272_p3, %p2266_p0 }
 0x1e4   :  { %2040 = vmatpush3.bf16.msra.mxu1 %v2039_v11  ;;  %2112 = vmatpush3.bf16.msra.mxu0 %v2946_v6 }
 0x1e5   :  { %2041 = vmatprep.subr.bf16.mxu1 %v2294_v40  ;;  %2113 = vmatprep.subr.bf16.mxu0 %v2294_v40 }
 0x1e8   :  { %2043 = vmatpush3.bf16.msra.mxu1 %v2042_v35  ;;  %2115 = vmatpush3.bf16.msra.mxu0 %v2973_v52 }
 0x1e9   :  { %2044 = vmatprep.subr.bf16.mxu1 %v2294_v40  ;;  %2116 = vmatprep.subr.bf16.mxu0 %v2294_v40  ;;  %v2298_v40 = vmov 1  }
 0x1ea   :  { %2162 = vset.pattern.permute.xlu1 %v2298_v40 }
 0x1ec   :  { %2046 = vmatpush3.bf16.msra.mxu1 %v2045_v57  ;;  %2118 = vmatpush3.bf16.msra.mxu0 %v3021_v38 }
 0x1ef   :  { %1844 = vmatmul.mubr.f32.vlgmr.msra.gmra.mrb[0].mxu1 %v2951_v43  ;;  %1967 = vmatmul.mubr.msk.f32.vlgmr.msra.gmra.mrb[0].mxu0 %vm763_vm4, %v2297_v31 }
 0x1f0   :  { %1846 = vmatprep.mubr.msk.f32.mxu1 %vm2295_vm0, %v2296_v8  ;;  %1969 = vmatprep.mubr.msk.f32.mxu0 %vm2295_vm0, %v2296_v8 }
 0x1f3   :  { %1847 = vmatmul.mubr.f32.gmra.mrb[2].mxu1 %v3085_v54  ;;  %1970 = vmatmul.mubr.msk.f32.gmra.mrb[2].mxu0 %vm764_vm5, %v2297_v31 }
 0x1f4   :  { %1849 = vmatprep.mubr.msk.f32.mxu1 %vm2295_vm0, %v2296_v8  ;;  %1972 = vmatprep.mubr.msk.f32.mxu0 %vm2295_vm0, %v2296_v8 }
 0x1f7   :  { %1850 = vmatmul.mubr.f32.gmra.mrb[4].mxu1 %v3107_v3  ;;  %1973 = vmatmul.mubr.msk.f32.gmra.mrb[4].mxu0 %vm765_vm6, %v2297_v31 }
 0x2c2   :  { %v1146_v19 = vpop.f32.mrb[0].mxu1  ;;  %v1483_v6 = vpop.f32.mrb[0].mxu0 }
 0x2c3   :  { %v2119_v43 = vadd.f32 %v1483_v6, %v1146_v19  ;;  %v1845_v53 = vpop.f32.mrb[1].mxu1  ;;  %v1968_v52 = vpop.f32.mrb[1].mxu0 }
 0x2c5   :  { %1526 = vperm.xlu1 %2162, %v2119_v43   ;;  %1509 = vperm.xlu0 %2160, %v2119_v43  }
 0x2c6   :  { %v1153_v36 = vpop.f32.mrb[2].mxu1  ;;  %v1489_v0 = vpop.f32.mrb[2].mxu0 }
 0x2c7   :  { %v2120_v13 = vadd.f32 %v1489_v0, %v1153_v36  ;;  %v1848_v59 = vpop.f32.mrb[3].mxu1  ;;  %v1971_v8 = vpop.f32.mrb[3].mxu0 }
 0x2c9   :  { %2163 = vset.pattern.permute.xlu1 %v2292_v48  ;;  %2164 = vset.pattern.permute.xlu0 %v2298_v40 }
 0x2ca   :  { %v1495_v38 = vpop.f32.mrb[4].mxu0  ;;  %1530 = vperm.xlu0 %2164, %v2120_v13   ;;  %1514 = vperm.xlu1 %2163, %v2120_v13   ;;  %v1160_v16 = vpop.f32.mrb[4].mxu1 }
 0x2cb   :  { %v2121_v5 = vadd.f32 %v1495_v38, %v1160_v16  ;;  %v1851_v20 = vpop.f32.mrb[5].mxu1  ;;  %v1974_v44 = vpop.f32.mrb[5].mxu0 }
 0x2ce   :  { %2165 = vset.pattern.permute.xlu0 %v2292_v48  ;;  %2166 = vset.pattern.permute.xlu1 %v2298_v40  ;;  %v1613_v48 = vld [vmem:[%s3294_s4] ss:$0 sm:$0xff] }
 0x2cf   :  { %1534 = vperm.xlu1 %2166, %v2121_v5   ;;  %1519 = vperm.xlu0 %2165, %v2121_v5  }
 0x2d3   :  { %2167 = vset.pattern.permute.xlu1 %v2299_v62  ;;  %2168 = vset.pattern.permute.xlu0 %v2299_v62 }
 0x2d4   :  { %1563 = vperm.xlu1 %2167, %v2119_v43   ;;  %1567 = vperm.xlu0 %2168, %v2120_v13  }
 0x2d8   :  { %1571 = vperm.xlu1 %2167, %v2121_v5  }
 0x344   :  { %v1527_v2 = vpop.permute.xlu1 %1526  ;;  %v1510_v28 = vpop.permute.xlu0 %1509 }
 0x345   :  { %v1522_v54 = vsub.f32 %v1499_v1, %v1510_v28 }
 0x347   :  { %v1537_v32 = vmul.f32 %v1527_v2, %v1522_v54 }
 0x349   :  { %v1546_v3 = vmul.f32 %v1613_v48, %v1537_v32  ;;  %v1531_v46 = vpop.permute.xlu0 %1530  ;;  %v1515_v45 = vpop.permute.xlu1 %1514 }
 0x34a   :  { %v1523_v55 = vsub.f32 %v1500_v60, %v1515_v45 }
 0x34b   :  { %v1555_v12 = vadd.f32 %v1614_v21, %v1546_v3 }
 0x34c   :  { %v1538_v4 = vmul.f32 %v1531_v46, %v1523_v55 }
 0x34d   :  { %1559 = vst.msk [vmem:[#allocation2] sm:$0xff] %vm1558_vm7, %v1555_v12 }
 0x34e   :  { %v1547_v63 = vmul.f32 %v1613_v48, %v1538_v4  ;;  %v1535_v42 = vpop.permute.xlu1 %1534  ;;  %v1520_v15 = vpop.permute.xlu0 %1519 }
 0x34f   :  { %v1524_v24 = vsub.f32 %v1501_v56, %v1520_v15 }
 0x350   :  { %v1556_v25 = vadd.f32 %v1614_v21, %v1547_v63 }
 0x351   :  { %v1539_v49 = vmul.f32 %v1535_v42, %v1524_v24 }
 0x352   :  { %1560 = vst.msk [vmem:[#allocation2 + $0x8] sm:$0xff] %vm1558_vm7, %v1556_v25 }
 0x353   :  { %v1548_v51 = vmul.f32 %v1613_v48, %v1539_v49  ;;  %v1564_v22 = vpop.permute.xlu1 %1563  ;;  %v1568_v9 = vpop.permute.xlu0 %1567 }
 0x354   :  { %v1574_v10 = vmul.f32 %v1564_v22, %v1502_v61  ;;  %v1575_v58 = vmul.f32 %v1568_v9, %v1503_v41 }
 0x355   :  { %v1557_v27 = vadd.f32 %v1614_v21, %v1548_v51 }
 0x356   :  { %1578 = vst.msk [vmem:[%s3297_s7] sm:$0xff] %vm1577_vm8, %v1574_v10  ;;  %1579 = vst.msk [vmem:[%s3297_s7 + $0x8] sm:$0xff] %vm1577_vm8, %v1575_v58 }
 0x357   :  { %1561 = vst.msk [vmem:[#allocation2 + $0x10] sm:$0xff] %vm1558_vm7, %v1557_v27  ;;  %v1572_v14 = vpop.permute.xlu1 %1571 }
 0x358   :  { %v1576_v37 = vmul.f32 %v1572_v14, %v1504_v50 }
 0x359   :  { %2276 = shalt.err (!%p2273_p4)
}
 0x35a   :  { %s2277_s15 = scalar_lea.hbm %s3296_s6, 384 }
 0x35b   :  { %p2278_p5 = scmp.ne.s32.totalorder %s3296_s6, %s2277_s15  ;;  %p2281_p6 = scmp.lt.u32.totalorder %s2277_s15, %s3296_s6 }
 0x35d   :  { %p2283_p7 = pnand %p2281_p6, %p2278_p5 }
 0x35f   :  { %2286 = shalt.err (!%p2283_p7)
}
 0x360   :  { %s2301_s19 = smov 128   ;;  %s2302_s20 = smov 8   ;;  %1580 = vst.msk [vmem:[%s3297_s7 + $0x10] sm:$0xff] %vm1577_vm8, %v1576_v37 }
 0x361   :  { %1592 = dma.vmem_to_hbm [thread:$0]  %s1587_s2, 384, %s3296_s6, [#allocation3], %s2301_s19, %s2301_s19, %s2302_s20  }
 0x362   :  { %2287 = dma.done.wait [#allocation3], 384  }
 0x363   :  { %2288 = vsyncadd [#allocation3], 4294966912 }
 0x364   :  { %1600 = vsyncpa [#allocation3], 1 }

</bundles_post_ra>
